<compile_context>
chip_gen: v7x
topology: tpu7x:2x2x1
jax: 0.10.0
libtpu: 0.0.40
codegen_flags: <defaults>
</compile_context>

<pallas_src>
import math
import numpy as np
import jax
import jax.numpy as jnp
from jax import lax
from jax.experimental import pallas as pl
from jax.experimental.pallas import tpu as pltpu

# Small, module-consistent shapes.
B, L, D = 2, 8, 32           # batch, seq, d_model
H = 4                        # heads (d_model % h == 0 -> dh = 8)
DH = D // H
D_INNER = 64
MAX_SEQ = 32                 # relative-embedding table length (>= L)
EPS = 1e-6

X = H * B                    # flattened (head, batch) attention-batch axis, x = h*B + b
W = L * L                    # widened relative-position axis (i', j) -> i'*L + j
D1 = D + 1                   # d_model + ones column (carries the fused q/k/v bias)
E3 = 3 * DH                  # fused per-head q|k|v projection width
INV_SQRT_DH = 1.0 / math.sqrt(DH)

# Row layout of the per-head 3-D parameter slab (H, SLAB_A_ROWS, D).
R_QKV = 0                    # rows 0..D    : per-head [Wq|Wk|Wv] + bias row (D1 rows, E3 lanes)
R_FC = 40                    # rows 40..47  : per-head rows of the output projection (DH rows, D lanes)
SLAB_A_ROWS = R_FC + DH      # 48

# Row layout of the 2-D parameter slab (SLAB_B_ROWS, 64).
R_W1 = 0                     # rows 0..31   : FFN_pre weight (D, D_INNER)
R_W2 = R_W1 + D              # rows 32..95  : FFN_suf weight (D_INNER, D)
R_EREL = R_W2 + D_INNER      # rows 96..103 : skewed + qe-masked relative table (DH, L*L)
R_BM = R_EREL + DH           # rows 104..111: block-diagonal 0/1 mask (L, L*L)
R_VEC = R_BM + L             # rows 112..119: packed bias/gain rows
SLAB_B_ROWS = R_VEC + 8      # 120


def encoder_layer_kernel(x_ref, pa_ref, pb_ref, o_ref):
    f32 = jnp.float32

    # ---- static views into the two packed parameter slabs (no extra DMAs) ----
    wqkv = pa_ref[:, R_QKV:R_QKV + D1, 0:E3]            # (H, D1, 3*DH)
    wfc = pa_ref[:, R_FC:R_FC + DH, 0:D]                # (H, DH, D)
    w1 = pb_ref[R_W1:R_W1 + D, 0:D_INNER]               # (D, D_INNER)
    w2 = pb_ref[R_W2:R_W2 + D_INNER, 0:D]               # (D_INNER, D)
    erel = pb_ref[R_EREL:R_EREL + DH, 0:W]              # (DH, L*L)
    bm = pb_ref[R_BM:R_BM + L, 0:W]                     # (L, L*L) 0/1
    vec = pb_ref[R_VEC:R_VEC + 8, :]                    # (8, 64)
    bfc, g1 = vec[0:1, 0:D], vec[0:1, D:2 * D]
    be1, g2 = vec[1:2, 0:D], vec[1:2, D:2 * D]
    be2, b2 = vec[2:3, 0:D], vec[2:3, D:2 * D]
    b1 = vec[3:4, 0:D_INNER]

    x_aug = x_ref[...]                                  # (B, L, D+1), last lane == 1
    x_res = x_aug[:, :, 0:D]                            # residual input

    # ---- fused q/k/v projection (bias via the ones-column), head-batched on the MXU ----
    xh = jnp.broadcast_to(x_aug[None], (H, B, L, D1)).reshape(X, L, D1)
    wqkv_x = jnp.broadcast_to(wqkv[:, None], (H, B, D1, E3)).reshape(X, D1, E3)
    qkv = jnp.einsum('xld,xde->xle', xh, wqkv_x, preferred_element_type=f32)  # (X, L, 3*DH)
    # 1/sqrt(dh) folded into q once (both QK^T and Srel are linear in q).
    q = qkv[:, :, 0:DH] * INV_SQRT_DH
    k = qkv[:, :, DH:2 * DH]
    v = qkv[:, :, 2 * DH:E3]

    # ---- content scores on the MXU ----
    scores = jnp.einsum('xld,xmd->xlm', q, k, preferred_element_type=f32)     # (X, L, L)

    # ---- relative term on the MXU:
    #      QE_wide[x, i, i'*L+j] = q[x,i] . E_rel[i',j]   (skew + qe-mask baked into erel),
    #      then keep the i'==i block per query row and fold the wide axis back to L.
    erel_x = jnp.broadcast_to(erel[None], (X, DH, W))
    qe_wide = jnp.einsum('xld,xdw->xlw', q, erel_x, preferred_element_type=f32)  # (X, L, L*L)
    qe_wide = qe_wide * bm[None]
    srel = qe_wide[:, :, 0:L]
    for blk in range(1, L):
        srel = srel + qe_wide[:, :, blk * L:(blk + 1) * L]                       # (X, L, L)

    # ---- softmax (mask=None path; reciprocal on the EUP) ----
    logits = scores + srel
    logits = logits - jnp.max(logits, axis=-1, keepdims=True)
    p = jnp.exp(logits)
    p = p * pl.reciprocal(jnp.sum(p, axis=-1, keepdims=True), approx=True)

    attn = jnp.einsum('xlm,xmd->xld', p, v, preferred_element_type=f32)          # (X, L, DH)

    # ---- per-head output projection + head sum (static leading-axis slices) ----
    wfc_x = jnp.broadcast_to(wfc[:, None], (H, B, DH, D)).reshape(X, DH, D)
    part = jnp.einsum('xld,xde->xle', attn, wfc_x, preferred_element_type=f32)   # (X, L, D)
    attn_out = part[0:B]
    for h in range(1, H):
        attn_out = attn_out + part[h * B:(h + 1) * B]                            # (B, L, D)
    attn_out = attn_out + bfc

    # ---- residual + LayerNorm 1 (dropout = identity at inference) ----
    y = attn_out + x_res
    mu = jnp.mean(y, axis=-1, keepdims=True)
    var = jnp.mean((y - mu) ** 2, axis=-1, keepdims=True)
    out1 = (y - mu) * lax.rsqrt(var + EPS) * g1 + be1

    # ---- FFN (unreplicated weights, broadcast over batch in VMEM) ----
    w1_b = jnp.broadcast_to(w1[None], (B, D, D_INNER))
    w2_b = jnp.broadcast_to(w2[None], (B, D_INNER, D))
    hid = jnp.einsum('bld,bdf->blf', out1, w1_b, preferred_element_type=f32) + b1
    hid = jnp.maximum(hid, 0.0)
    ffn = jnp.einsum('blf,bfd->bld', hid, w2_b, preferred_element_type=f32) + b2

    # ---- residual + LayerNorm 2 (dropout2 identity) ----
    z = out1 + ffn
    mu2 = jnp.mean(z, axis=-1, keepdims=True)
    var2 = jnp.mean((z - mu2) ** 2, axis=-1, keepdims=True)
    out2 = (z - mu2) * lax.rsqrt(var2 + EPS) * g2 + be2

    o_ref[...] = out2.astype(o_ref.dtype)


def _pack_params(Wq, bq, Wk, bk, Wv, bv, Wfc, bfc, E, W1, b1, W2, b2, g1, be1, g2, be2):
    """Call-invariant parameter packing (in a real model this runs once at load time)."""
    f32 = jnp.float32

    def heads(Wm):                       # (D, D) -> (H, D, DH)
        return Wm.reshape(D, H, DH).transpose(1, 0, 2)

    def headb(bv_):                      # (D,) -> (H, 1, DH)
        return bv_.reshape(H, 1, DH)

    # Slab A: per-head [Wq|Wk|Wv] with an appended bias row, plus per-head Wfc rows.
    wqkv = jnp.concatenate(
        [jnp.concatenate([heads(Wq), heads(Wk), heads(Wv)], axis=2),     # (H, D, 3DH)
         jnp.concatenate([headb(bq), headb(bk), headb(bv)], axis=2)],    # (H, 1, 3DH)
        axis=1)                                                          # (H, D1, 3DH)
    slab_a = jnp.zeros((H, SLAB_A_ROWS, D), f32)
    slab_a = slab_a.at[:, R_QKV:R_QKV + D1, 0:E3].set(wqkv.astype(f32))
    slab_a = slab_a.at[:, R_FC:R_FC + DH, :].set(Wfc.reshape(H, DH, D).astype(f32))

    # Slab B: FFN weights, skewed/masked relative table, block mask, bias/gain rows.
    E_sl = E[MAX_SEQ - L:, :]                                            # (L, DH)
    ii = jnp.arange(L)[:, None]
    jj = jnp.arange(L)[None, :]
    idx = jnp.clip(L - 1 - ii + jj, 0, L - 1)
    # erel[i, j, :] = E_sl[L-1-i+j] * (j <= i)  (clip is safe only together with the mask)
    erel = E_sl[idx] * (jj <= ii)[:, :, None].astype(f32)                # (L, L, DH)
    erel_t = erel.reshape(W, DH).T                                       # (DH, L*L)
    bmask = (jnp.arange(L)[:, None] == (jnp.arange(W)[None, :] // L)).astype(f32)  # (L, L*L)

    slab_b = jnp.zeros((SLAB_B_ROWS, D_INNER), f32)
    slab_b = slab_b.at[R_W1:R_W1 + D, :].set(W1.astype(f32))
    slab_b = slab_b.at[R_W2:R_W2 + D_INNER, 0:D].set(W2.astype(f32))
    slab_b = slab_b.at[R_EREL:R_EREL + DH, 0:W].set(erel_t.astype(f32))
    slab_b = slab_b.at[R_BM:R_BM + L, 0:W].set(bmask)
    vec = jnp.zeros((8, D_INNER), f32)
    vec = vec.at[0, 0:D].set(bfc).at[0, D:2 * D].set(g1)
    vec = vec.at[1, 0:D].set(be1).at[1, D:2 * D].set(g2)
    vec = vec.at[2, 0:D].set(be2).at[2, D:2 * D].set(b2)
    vec = vec.at[3, 0:D_INNER].set(b1)
    slab_b = slab_b.at[R_VEC:R_VEC + 8, :].set(vec)
    return slab_a, slab_b


def encoder_layer(x, Wq, bq, Wk, bk, Wv, bv, Wfc, bfc, E,
                  W1, b1, W2, b2, g1, be1, g2, be2):
    slab_a, slab_b = _pack_params(Wq, bq, Wk, bk, Wv, bv, Wfc, bfc, E,
                                  W1, b1, W2, b2, g1, be1, g2, be2)
    # Augment x with a ones column so the q/k/v biases ride the fused projection matmul.
    x_aug = jnp.concatenate([x.astype(jnp.float32),
                             jnp.ones((B, L, 1), jnp.float32)], axis=-1)     # (B, L, D+1)

    mac = (X * L * D1 * E3 + X * L * L * DH + X * L * DH * W + X * L * L * DH
           + X * L * DH * D + 2 * B * L * D * D_INNER)
    bytes_acc = 4 * (B * L * D1 + H * SLAB_A_ROWS * D + SLAB_B_ROWS * D_INNER + B * L * D)
    cost = pl.CostEstimate(flops=2 * mac,
                           transcendentals=X * L * L + X * L + 4 * B * L,
                           bytes_accessed=bytes_acc)

    return pl.pallas_call(
        encoder_layer_kernel,
        out_shape=jax.ShapeDtypeStruct((B, L, D), jnp.float32),
        grid_spec=pltpu.PrefetchScalarGridSpec(
            num_scalar_prefetch=0,
            grid=(1,),
            in_specs=[
                pl.BlockSpec((B, L, D1), lambda i: (0, 0, 0)),
                pl.BlockSpec((H, SLAB_A_ROWS, D), lambda i: (0, 0, 0)),
                pl.BlockSpec((SLAB_B_ROWS, D_INNER), lambda i: (0, 0)),
            ],
            out_specs=pl.BlockSpec((B, L, D), lambda i: (0, 0, 0)),
        ),
        compiler_params=pltpu.CompilerParams(dimension_semantics=("arbitrary",)),
        cost_estimate=cost,
    )(x_aug, slab_a, slab_b)


# ------------------------- pure-JAX reference (mirrors torch code) -------------------------
def ref_encoder(x, Wq, bq, Wk, bk, Wv, bv, Wfc, bfc, E,
                W1, b1, W2, b2, g1, be1, g2, be2):
    Bx, Lx, Dx = x.shape
    q = (x @ Wq + bq).reshape(Bx, Lx, H, DH).transpose(0, 2, 1, 3)
    k = (x @ Wk + bk).reshape(Bx, Lx, H, DH).transpose(0, 2, 1, 3)
    v = (x @ Wv + bv).reshape(Bx, Lx, H, DH).transpose(0, 2, 1, 3)
    E_sl = E[MAX_SEQ - Lx:, :]
    QE = jnp.einsum('bhld,md->bhlm', q, E_sl)
    lengths = jnp.arange(Lx - 1, -1, -1)
    seqmask = jnp.arange(Lx)[None, :] < lengths[:, None]
    QE = QE * (~seqmask).astype(QE.dtype)
    padded = jnp.pad(QE, ((0, 0), (0, 0), (0, 0), (1, 0)))
    Srel = padded.reshape(Bx, H, Lx + 1, Lx)[:, :, 1:, :]
    logits = (jnp.einsum('bhld,bhmd->bhlm', q, k) + Srel) / math.sqrt(DH)
    w = jax.nn.softmax(logits, axis=-1)
    attn = jnp.einsum('bhlm,bhmd->bhld', w, v)
    attn = attn.transpose(0, 2, 1, 3).reshape(Bx, Lx, Dx) @ Wfc + bfc

    def ln(y, g, be):
        mu = jnp.mean(y, axis=-1, keepdims=True)
        var = jnp.mean((y - mu) ** 2, axis=-1, keepdims=True)
        return (y - mu) / jnp.sqrt(var + EPS) * g + be

    out1 = ln(attn + x, g1, be1)
    ffn = jax.nn.relu(out1 @ W1 + b1) @ W2 + b2
    return ln(out1 + ffn, g2, be2)


if __name__ == "__main__":
    key = jax.random.PRNGKey(0)
    ks = jax.random.split(key, 16)
    x = jax.random.normal(ks[0], (B, L, D), jnp.float32)

    def lin(k, fan_in, fan_out):
        kw, kb = jax.random.split(k)
        w = jax.random.normal(kw, (fan_in, fan_out), jnp.float32) / np.sqrt(fan_in)
        b = 0.05 * jax.random.normal(kb, (fan_out,), jnp.float32)
        return w, b

    Wq, bq = lin(ks[1], D, D)
    Wk, bk = lin(ks[2], D, D)
    Wv, bv = lin(ks[3], D, D)
    Wfc, bfc = lin(ks[4], D, D)
    W1, b1 = lin(ks[5], D, D_INNER)
    W2, b2 = lin(ks[6], D_INNER, D)
    E = jax.random.normal(ks[7], (MAX_SEQ, DH), jnp.float32)
    g1 = 1.0 + 0.1 * jax.random.normal(ks[8], (D,), jnp.float32)
    be1 = 0.1 * jax.random.normal(ks[9], (D,), jnp.float32)
    g2 = 1.0 + 0.1 * jax.random.normal(ks[10], (D,), jnp.float32)
    be2 = 0.1 * jax.random.normal(ks[11], (D,), jnp.float32)

    args = (x, Wq, bq, Wk, bk, Wv, bv, Wfc, bfc, E, W1, b1, W2, b2, g1, be1, g2, be2)

    out = encoder_layer(*args)
    out = jax.block_until_ready(out)

    ref = jax.block_until_ready(ref_encoder(*args))
    np.testing.assert_allclose(np.asarray(out), np.asarray(ref), atol=2e-2, rtol=2e-2)

    print("KERNEL_OK")
</pallas_src>

<mosaic_0001>
module attributes {stable_mosaic.version = 11 : i64} {
  func.func @encoder_layer_kernel(%arg0: i32, %arg1: memref<2x8x33xf32, #tpu.memory_space<vmem>>, %arg2: memref<4x48x32xf32, #tpu.memory_space<vmem>>, %arg3: memref<120x64xf32, #tpu.memory_space<vmem>>, %arg4: memref<2x8x32xf32, #tpu.memory_space<vmem>>) attributes {dimension_semantics = [#tpu.dimension_semantics<arbitrary>], iteration_bounds = array<i64: 1>, scalar_prefetch = 0 : i64, scratch_operands = 0 : i64, tpu.core_type = #tpu.core_type<tc>, window_params = [{pipeline_mode = #tpu.pipeline_mode<synchronous>, transform_indices = @transform_0, window_bounds = array<i64: 2, 8, 33>}, {pipeline_mode = #tpu.pipeline_mode<synchronous>, transform_indices = @transform_1, window_bounds = array<i64: 4, 48, 32>}, {pipeline_mode = #tpu.pipeline_mode<synchronous>, transform_indices = @transform_2, window_bounds = array<i64: 120, 64>}, {pipeline_mode = #tpu.pipeline_mode<synchronous>, transform_indices = @transform_3, window_bounds = array<i64: 2, 8, 32>}]} {
    %c0 = arith.constant 0 : index
    %c0_0 = arith.constant 0 : index
    %c0_1 = arith.constant 0 : index
    %0 = vector.load %arg2[%c0, %c0_0, %c0_1] : memref<4x48x32xf32, #tpu.memory_space<vmem>>, vector<4x33x24xf32>
    %c0_2 = arith.constant 0 : index
    %c40 = arith.constant 40 : index
    %c0_3 = arith.constant 0 : index
    %1 = vector.load %arg2[%c0_2, %c40, %c0_3] : memref<4x48x32xf32, #tpu.memory_space<vmem>>, vector<4x8x32xf32>
    %c0_4 = arith.constant 0 : index
    %c0_5 = arith.constant 0 : index
    %2 = vector.load %arg3[%c0_4, %c0_5] : memref<120x64xf32, #tpu.memory_space<vmem>>, vector<32x64xf32>
    %c32 = arith.constant 32 : index
    %c0_6 = arith.constant 0 : index
    %3 = vector.load %arg3[%c32, %c0_6] : memref<120x64xf32, #tpu.memory_space<vmem>>, vector<64x32xf32>
    %c96 = arith.constant 96 : index
    %c0_7 = arith.constant 0 : index
    %4 = vector.load %arg3[%c96, %c0_7] : memref<120x64xf32, #tpu.memory_space<vmem>>, vector<8x64xf32>
    %c104 = arith.constant 104 : index
    %c0_8 = arith.constant 0 : index
    %5 = vector.load %arg3[%c104, %c0_8] : memref<120x64xf32, #tpu.memory_space<vmem>>, vector<8x64xf32>
    %c112 = arith.constant 112 : index
    %c0_9 = arith.constant 0 : index
    %6 = vector.load %arg3[%c112, %c0_9] : memref<120x64xf32, #tpu.memory_space<vmem>>, vector<8x64xf32>
    %7 = vector.extract_strided_slice %6 {offsets = [0, 0], sizes = [1, 32], strides = [1, 1]} : vector<8x64xf32> to vector<1x32xf32>
    %8 = vector.extract_strided_slice %6 {offsets = [0, 32], sizes = [1, 32], strides = [1, 1]} : vector<8x64xf32> to vector<1x32xf32>
    %9 = vector.extract_strided_slice %6 {offsets = [1, 0], sizes = [1, 32], strides = [1, 1]} : vector<8x64xf32> to vector<1x32xf32>
    %10 = vector.extract_strided_slice %6 {offsets = [1, 32], sizes = [1, 32], strides = [1, 1]} : vector<8x64xf32> to vector<1x32xf32>
    %11 = vector.extract_strided_slice %6 {offsets = [2, 0], sizes = [1, 32], strides = [1, 1]} : vector<8x64xf32> to vector<1x32xf32>
    %12 = vector.extract_strided_slice %6 {offsets = [2, 32], sizes = [1, 32], strides = [1, 1]} : vector<8x64xf32> to vector<1x32xf32>
    %13 = vector.extract_strided_slice %6 {offsets = [3, 0], sizes = [1, 64], strides = [1, 1]} : vector<8x64xf32> to vector<1x64xf32>
    %c0_10 = arith.constant 0 : index
    %c0_11 = arith.constant 0 : index
    %c0_12 = arith.constant 0 : index
    %14 = vector.load %arg1[%c0_10, %c0_11, %c0_12] : memref<2x8x33xf32, #tpu.memory_space<vmem>>, vector<2x8x33xf32>
    %15 = vector.extract_strided_slice %14 {offsets = [0, 0, 0], sizes = [2, 8, 32], strides = [1, 1, 1]} : vector<2x8x33xf32> to vector<2x8x32xf32>
    %16 = vector.shape_cast %14 : vector<2x8x33xf32> to vector<1x2x8x33xf32>
    %17 = vector.shape_cast %16 : vector<1x2x8x33xf32> to vector<1x2x8x33xf32>
    %18 = vector.broadcast %17 : vector<1x2x8x33xf32> to vector<4x2x8x33xf32>
    %19 = vector.shape_cast %18 : vector<4x2x8x33xf32> to vector<8x8x33xf32>
    %20 = vector.shape_cast %0 : vector<4x33x24xf32> to vector<4x1x33x24xf32>
    %21 = vector.shape_cast %20 : vector<4x1x33x24xf32> to vector<4x1x33x24xf32>
    %22 = vector.broadcast %21 : vector<4x1x33x24xf32> to vector<4x2x33x24xf32>
    %23 = vector.shape_cast %22 : vector<4x2x33x24xf32> to vector<8x33x24xf32>
    "tpu.trace_start"() <{level = 10 : i32, message = "xld,xde->xle"}> : () -> ()
    %cst = arith.constant dense<0.000000e+00> : vector<8x8x24xf32>
    %24 = tpu.matmul %19, %23, %cst {dimension_numbers = #tpu.dot_dimension_numbers<[2], [1], [1], [2], [0, 0, 0, 1, 1, 2], [0], [0]>} : vector<8x8x33xf32>, vector<8x33x24xf32>, vector<8x8x24xf32> -> vector<8x8x24xf32>
    "tpu.trace_stop"() : () -> ()
    %25 = vector.extract_strided_slice %24 {offsets = [0, 0, 0], sizes = [8, 8, 8], strides = [1, 1, 1]} : vector<8x8x24xf32> to vector<8x8x8xf32>
    %cst_13 = arith.constant 0.353553385 : f32
    %26 = vector.broadcast %cst_13 : f32 to vector<8x8x8xf32>
    %27 = arith.mulf %25, %26 : vector<8x8x8xf32>
    %28 = vector.extract_strided_slice %24 {offsets = [0, 0, 8], sizes = [8, 8, 8], strides = [1, 1, 1]} : vector<8x8x24xf32> to vector<8x8x8xf32>
    %29 = vector.extract_strided_slice %24 {offsets = [0, 0, 16], sizes = [8, 8, 8], strides = [1, 1, 1]} : vector<8x8x24xf32> to vector<8x8x8xf32>
    "tpu.trace_start"() <{level = 10 : i32, message = "xld,xmd->xlm"}> : () -> ()
    %cst_14 = arith.constant dense<0.000000e+00> : vector<8x8x8xf32>
    %30 = tpu.matmul %27, %28, %cst_14 {dimension_numbers = #tpu.dot_dimension_numbers<[2], [2], [1], [1], [0, 0, 0, 1, 1, 1], [0], [0]>} : vector<8x8x8xf32>, vector<8x8x8xf32>, vector<8x8x8xf32> -> vector<8x8x8xf32>
    "tpu.trace_stop"() : () -> ()
    %31 = vector.shape_cast %4 : vector<8x64xf32> to vector<1x8x64xf32>
    %32 = vector.shape_cast %31 : vector<1x8x64xf32> to vector<1x8x64xf32>
    %33 = vector.broadcast %32 : vector<1x8x64xf32> to vector<8x8x64xf32>
    "tpu.trace_start"() <{level = 10 : i32, message = "xld,xdw->xlw"}> : () -> ()
    %cst_15 = arith.constant dense<0.000000e+00> : vector<8x8x64xf32>
    %34 = tpu.matmul %27, %33, %cst_15 {dimension_numbers = #tpu.dot_dimension_numbers<[2], [1], [1], [2], [0, 0, 0, 1, 1, 2], [0], [0]>} : vector<8x8x8xf32>, vector<8x8x64xf32>, vector<8x8x64xf32> -> vector<8x8x64xf32>
    "tpu.trace_stop"() : () -> ()
    %35 = vector.shape_cast %5 : vector<8x64xf32> to vector<1x8x64xf32>
    %36 = vector.broadcast %35 : vector<1x8x64xf32> to vector<8x8x64xf32>
    %37 = arith.mulf %34, %36 : vector<8x8x64xf32>
    %38 = vector.extract_strided_slice %37 {offsets = [0, 0, 0], sizes = [8, 8, 8], strides = [1, 1, 1]} : vector<8x8x64xf32> to vector<8x8x8xf32>
    %39 = vector.extract_strided_slice %37 {offsets = [0, 0, 8], sizes = [8, 8, 8], strides = [1, 1, 1]} : vector<8x8x64xf32> to vector<8x8x8xf32>
    %40 = arith.addf %38, %39 : vector<8x8x8xf32>
    %41 = vector.extract_strided_slice %37 {offsets = [0, 0, 16], sizes = [8, 8, 8], strides = [1, 1, 1]} : vector<8x8x64xf32> to vector<8x8x8xf32>
    %42 = arith.addf %40, %41 : vector<8x8x8xf32>
    %43 = vector.extract_strided_slice %37 {offsets = [0, 0, 24], sizes = [8, 8, 8], strides = [1, 1, 1]} : vector<8x8x64xf32> to vector<8x8x8xf32>
    %44 = arith.addf %42, %43 : vector<8x8x8xf32>
    %45 = vector.extract_strided_slice %37 {offsets = [0, 0, 32], sizes = [8, 8, 8], strides = [1, 1, 1]} : vector<8x8x64xf32> to vector<8x8x8xf32>
    %46 = arith.addf %44, %45 : vector<8x8x8xf32>
    %47 = vector.extract_strided_slice %37 {offsets = [0, 0, 40], sizes = [8, 8, 8], strides = [1, 1, 1]} : vector<8x8x64xf32> to vector<8x8x8xf32>
    %48 = arith.addf %46, %47 : vector<8x8x8xf32>
    %49 = vector.extract_strided_slice %37 {offsets = [0, 0, 48], sizes = [8, 8, 8], strides = [1, 1, 1]} : vector<8x8x64xf32> to vector<8x8x8xf32>
    %50 = arith.addf %48, %49 : vector<8x8x8xf32>
    %51 = vector.extract_strided_slice %37 {offsets = [0, 0, 56], sizes = [8, 8, 8], strides = [1, 1, 1]} : vector<8x8x64xf32> to vector<8x8x8xf32>
    %52 = arith.addf %50, %51 : vector<8x8x8xf32>
    %53 = arith.addf %30, %52 : vector<8x8x8xf32>
    %cst_16 = arith.constant dense<0xFF800000> : vector<8x8xf32>
    %54 = vector.multi_reduction <maximumf>, %53, %cst_16 [2] : vector<8x8x8xf32> to vector<8x8xf32>
    %55 = vector.shape_cast %54 : vector<8x8xf32> to vector<8x8x1xf32>
    %56 = vector.broadcast %55 : vector<8x8x1xf32> to vector<8x8x8xf32>
    %57 = arith.subf %53, %56 : vector<8x8x8xf32>
    %58 = math.exp %57 : vector<8x8x8xf32>
    %cst_17 = arith.constant dense<0.000000e+00> : vector<8x8xf32>
    %59 = vector.multi_reduction <add>, %58, %cst_17 [2] : vector<8x8x8xf32> to vector<8x8xf32>
    %60 = vector.shape_cast %59 : vector<8x8xf32> to vector<8x8x1xf32>
    %61 = tpu.reciprocal %60 {approx = true} : vector<8x8x1xf32> -> vector<8x8x1xf32>
    %62 = vector.broadcast %61 : vector<8x8x1xf32> to vector<8x8x8xf32>
    %63 = arith.mulf %58, %62 : vector<8x8x8xf32>
    "tpu.trace_start"() <{level = 10 : i32, message = "xlm,xmd->xld"}> : () -> ()
    %cst_18 = arith.constant dense<0.000000e+00> : vector<8x8x8xf32>
    %64 = tpu.matmul %63, %29, %cst_18 {dimension_numbers = #tpu.dot_dimension_numbers<[2], [1], [1], [2], [0, 0, 0, 1, 1, 2], [0], [0]>} : vector<8x8x8xf32>, vector<8x8x8xf32>, vector<8x8x8xf32> -> vector<8x8x8xf32>
    "tpu.trace_stop"() : () -> ()
    %65 = vector.shape_cast %1 : vector<4x8x32xf32> to vector<4x1x8x32xf32>
    %66 = vector.shape_cast %65 : vector<4x1x8x32xf32> to vector<4x1x8x32xf32>
    %67 = vector.broadcast %66 : vector<4x1x8x32xf32> to vector<4x2x8x32xf32>
    %68 = vector.shape_cast %67 : vector<4x2x8x32xf32> to vector<8x8x32xf32>
    "tpu.trace_start"() <{level = 10 : i32, message = "xld,xde->xle"}> : () -> ()
    %cst_19 = arith.constant dense<0.000000e+00> : vector<8x8x32xf32>
    %69 = tpu.matmul %64, %68, %cst_19 {dimension_numbers = #tpu.dot_dimension_numbers<[2], [1], [1], [2], [0, 0, 0, 1, 1, 2], [0], [0]>} : vector<8x8x8xf32>, vector<8x8x32xf32>, vector<8x8x32xf32> -> vector<8x8x32xf32>
    "tpu.trace_stop"() : () -> ()
    %70 = vector.extract_strided_slice %69 {offsets = [0, 0, 0], sizes = [2, 8, 32], strides = [1, 1, 1]} : vector<8x8x32xf32> to vector<2x8x32xf32>
    %71 = vector.extract_strided_slice %69 {offsets = [2, 0, 0], sizes = [2, 8, 32], strides = [1, 1, 1]} : vector<8x8x32xf32> to vector<2x8x32xf32>
    %72 = arith.addf %70, %71 : vector<2x8x32xf32>
    %73 = vector.extract_strided_slice %69 {offsets = [4, 0, 0], sizes = [2, 8, 32], strides = [1, 1, 1]} : vector<8x8x32xf32> to vector<2x8x32xf32>
    %74 = arith.addf %72, %73 : vector<2x8x32xf32>
    %75 = vector.extract_strided_slice %69 {offsets = [6, 0, 0], sizes = [2, 8, 32], strides = [1, 1, 1]} : vector<8x8x32xf32> to vector<2x8x32xf32>
    %76 = arith.addf %74, %75 : vector<2x8x32xf32>
    %77 = vector.shape_cast %7 : vector<1x32xf32> to vector<1x1x32xf32>
    %78 = vector.broadcast %77 : vector<1x1x32xf32> to vector<2x8x32xf32>
    %79 = arith.addf %76, %78 : vector<2x8x32xf32>
    %80 = arith.addf %79, %15 : vector<2x8x32xf32>
    %cst_20 = arith.constant dense<0.000000e+00> : vector<2x8xf32>
    %81 = vector.multi_reduction <add>, %80, %cst_20 [2] : vector<2x8x32xf32> to vector<2x8xf32>
    %82 = vector.shape_cast %81 : vector<2x8xf32> to vector<2x8x1xf32>
    %cst_21 = arith.constant 3.200000e+01 : f32
    %83 = vector.broadcast %cst_21 : f32 to vector<2x8x1xf32>
    %84 = arith.divf %82, %83 : vector<2x8x1xf32>
    %85 = vector.broadcast %84 : vector<2x8x1xf32> to vector<2x8x32xf32>
    %86 = arith.subf %80, %85 : vector<2x8x32xf32>
    %87 = arith.mulf %86, %86 : vector<2x8x32xf32>
    %cst_22 = arith.constant dense<0.000000e+00> : vector<2x8xf32>
    %88 = vector.multi_reduction <add>, %87, %cst_22 [2] : vector<2x8x32xf32> to vector<2x8xf32>
    %89 = vector.shape_cast %88 : vector<2x8xf32> to vector<2x8x1xf32>
    %cst_23 = arith.constant 3.200000e+01 : f32
    %90 = vector.broadcast %cst_23 : f32 to vector<2x8x1xf32>
    %91 = arith.divf %89, %90 : vector<2x8x1xf32>
    %92 = vector.broadcast %84 : vector<2x8x1xf32> to vector<2x8x32xf32>
    %93 = arith.subf %80, %92 : vector<2x8x32xf32>
    %cst_24 = arith.constant 9.99999997E-7 : f32
    %94 = vector.broadcast %cst_24 : f32 to vector<2x8x1xf32>
    %95 = arith.addf %91, %94 : vector<2x8x1xf32>
    %96 = math.rsqrt %95 : vector<2x8x1xf32>
    %97 = vector.broadcast %96 : vector<2x8x1xf32> to vector<2x8x32xf32>
    %98 = arith.mulf %93, %97 : vector<2x8x32xf32>
    %99 = vector.shape_cast %8 : vector<1x32xf32> to vector<1x1x32xf32>
    %100 = vector.broadcast %99 : vector<1x1x32xf32> to vector<2x8x32xf32>
    %101 = arith.mulf %98, %100 : vector<2x8x32xf32>
    %102 = vector.shape_cast %9 : vector<1x32xf32> to vector<1x1x32xf32>
    %103 = vector.broadcast %102 : vector<1x1x32xf32> to vector<2x8x32xf32>
    %104 = arith.addf %101, %103 : vector<2x8x32xf32>
    %105 = vector.shape_cast %2 : vector<32x64xf32> to vector<1x32x64xf32>
    %106 = vector.shape_cast %105 : vector<1x32x64xf32> to vector<1x32x64xf32>
    %107 = vector.broadcast %106 : vector<1x32x64xf32> to vector<2x32x64xf32>
    %108 = vector.shape_cast %3 : vector<64x32xf32> to vector<1x64x32xf32>
    %109 = vector.shape_cast %108 : vector<1x64x32xf32> to vector<1x64x32xf32>
    %110 = vector.broadcast %109 : vector<1x64x32xf32> to vector<2x64x32xf32>
    "tpu.trace_start"() <{level = 10 : i32, message = "bld,bdf->blf"}> : () -> ()
    %cst_25 = arith.constant dense<0.000000e+00> : vector<2x8x64xf32>
    %111 = tpu.matmul %104, %107, %cst_25 {dimension_numbers = #tpu.dot_dimension_numbers<[2], [1], [1], [2], [0, 0, 0, 1, 1, 2], [0], [0]>} : vector<2x8x32xf32>, vector<2x32x64xf32>, vector<2x8x64xf32> -> vector<2x8x64xf32>
    "tpu.trace_stop"() : () -> ()
    %112 = vector.shape_cast %13 : vector<1x64xf32> to vector<1x1x64xf32>
    %113 = vector.broadcast %112 : vector<1x1x64xf32> to vector<2x8x64xf32>
    %114 = arith.addf %111, %113 : vector<2x8x64xf32>
    %cst_26 = arith.constant 0.000000e+00 : f32
    %115 = vector.broadcast %cst_26 : f32 to vector<2x8x64xf32>
    %116 = arith.maximumf %114, %115 : vector<2x8x64xf32>
    "tpu.trace_start"() <{level = 10 : i32, message = "blf,bfd->bld"}> : () -> ()
    %cst_27 = arith.constant dense<0.000000e+00> : vector<2x8x32xf32>
    %117 = tpu.matmul %116, %110, %cst_27 {dimension_numbers = #tpu.dot_dimension_numbers<[2], [1], [1], [2], [0, 0, 0, 1, 1, 2], [0], [0]>} : vector<2x8x64xf32>, vector<2x64x32xf32>, vector<2x8x32xf32> -> vector<2x8x32xf32>
    "tpu.trace_stop"() : () -> ()
    %118 = vector.shape_cast %12 : vector<1x32xf32> to vector<1x1x32xf32>
    %119 = vector.broadcast %118 : vector<1x1x32xf32> to vector<2x8x32xf32>
    %120 = arith.addf %117, %119 : vector<2x8x32xf32>
    %121 = arith.addf %104, %120 : vector<2x8x32xf32>
    %cst_28 = arith.constant dense<0.000000e+00> : vector<2x8xf32>
    %122 = vector.multi_reduction <add>, %121, %cst_28 [2] : vector<2x8x32xf32> to vector<2x8xf32>
    %123 = vector.shape_cast %122 : vector<2x8xf32> to vector<2x8x1xf32>
    %cst_29 = arith.constant 3.200000e+01 : f32
    %124 = vector.broadcast %cst_29 : f32 to vector<2x8x1xf32>
    %125 = arith.divf %123, %124 : vector<2x8x1xf32>
    %126 = vector.broadcast %125 : vector<2x8x1xf32> to vector<2x8x32xf32>
    %127 = arith.subf %121, %126 : vector<2x8x32xf32>
    %128 = arith.mulf %127, %127 : vector<2x8x32xf32>
    %cst_30 = arith.constant dense<0.000000e+00> : vector<2x8xf32>
    %129 = vector.multi_reduction <add>, %128, %cst_30 [2] : vector<2x8x32xf32> to vector<2x8xf32>
    %130 = vector.shape_cast %129 : vector<2x8xf32> to vector<2x8x1xf32>
    %cst_31 = arith.constant 3.200000e+01 : f32
    %131 = vector.broadcast %cst_31 : f32 to vector<2x8x1xf32>
    %132 = arith.divf %130, %131 : vector<2x8x1xf32>
    %133 = vector.broadcast %125 : vector<2x8x1xf32> to vector<2x8x32xf32>
    %134 = arith.subf %121, %133 : vector<2x8x32xf32>
    %cst_32 = arith.constant 9.99999997E-7 : f32
    %135 = vector.broadcast %cst_32 : f32 to vector<2x8x1xf32>
    %136 = arith.addf %132, %135 : vector<2x8x1xf32>
    %137 = math.rsqrt %136 : vector<2x8x1xf32>
    %138 = vector.broadcast %137 : vector<2x8x1xf32> to vector<2x8x32xf32>
    %139 = arith.mulf %134, %138 : vector<2x8x32xf32>
    %140 = vector.shape_cast %10 : vector<1x32xf32> to vector<1x1x32xf32>
    %141 = vector.broadcast %140 : vector<1x1x32xf32> to vector<2x8x32xf32>
    %142 = arith.mulf %139, %141 : vector<2x8x32xf32>
    %143 = vector.shape_cast %11 : vector<1x32xf32> to vector<1x1x32xf32>
    %144 = vector.broadcast %143 : vector<1x1x32xf32> to vector<2x8x32xf32>
    %145 = arith.addf %142, %144 : vector<2x8x32xf32>
    %c0_33 = arith.constant 0 : index
    %c0_34 = arith.constant 0 : index
    %c0_35 = arith.constant 0 : index
    %146 = vector.load %arg4[%c0_33, %c0_34, %c0_35] : memref<2x8x32xf32, #tpu.memory_space<vmem>>, vector<2x8x32xf32>
    tpu.vector_store %arg4[%c0_33, %c0_34, %c0_35], %145 {strides = array<i32>} : memref<2x8x32xf32, #tpu.memory_space<vmem>>, vector<2x8x32xf32>,
    return
  }
  func.func @transform_0(%arg0: i32) -> (i32, i32, i32) {
    %c0_i32 = arith.constant 0 : i32
    %c0_i32_0 = arith.constant 0 : i32
    %c0_i32_1 = arith.constant 0 : i32
    %c0_i32_2 = arith.constant 0 : i32
    return %c0_i32, %c0_i32_0, %c0_i32_1 : i32, i32, i32
  }
  func.func @transform_1(%arg0: i32) -> (i32, i32, i32) {
    %c0_i32 = arith.constant 0 : i32
    %c0_i32_0 = arith.constant 0 : i32
    %c0_i32_1 = arith.constant 0 : i32
    %c0_i32_2 = arith.constant 0 : i32
    return %c0_i32, %c0_i32_0, %c0_i32_1 : i32, i32, i32
  }
  func.func @transform_2(%arg0: i32) -> (i32, i32) {
    %c0_i32 = arith.constant 0 : i32
    %c0_i32_0 = arith.constant 0 : i32
    %c0_i32_1 = arith.constant 0 : i32
    return %c0_i32, %c0_i32_0 : i32, i32
  }
  func.func @transform_3(%arg0: i32) -> (i32, i32, i32) {
    %c0_i32 = arith.constant 0 : i32
    %c0_i32_0 = arith.constant 0 : i32
    %c0_i32_1 = arith.constant 0 : i32
    %c0_i32_2 = arith.constant 0 : i32
    return %c0_i32, %c0_i32_0, %c0_i32_1 : i32, i32, i32
  }
}

</mosaic_0001>

<bundles_post_ra>
// kernel: tpu_custom_call.1
= control target key start
LH: loop header
LB: loop body
LE: loop exit
PB: predicated region body
PF: predicated region fallthrough
CT: control target
= control target key end

     0   :  { %v4451_v3 = vmov 0.0|0.0   ;;  %vm4452_vm0 = vmmov 0   ;;  %v4453_v6 = vmov 0.0   ;;  %s5171_s0 = inlined_call_operand.vmem [shape: f32[2,8,33], index: 0, kind: input, shape index: {}]   ;;  %s5172_s1 = inlined_call_operand.vmem [shape: f32[4,48,32], index: 1, kind: input, shape index: {}]   ;;  %s5173_s2 = inlined_call_operand.vmem [shape: f32[120,64], index: 2, kind: input, shape index: {}]   ;;  %s5174_s3 = inlined_call_operand.hbm [shape: f32[2,8,32], index: 3, kind: output, shape index: {}]  }
   0x1   :  { %v15_v0 = vld [vmem:[%s5172_s1] sm:$0xff]  ;;  %v16_v1 = vld [vmem:[%s5172_s1 + $0x8] sm:$0xff]  ;;  %v17_v2 = vld [vmem:[%s5172_s1 + $0x10] sm:$0xff]  ;;  %4288 = vmatprep.subr.bf16.mxu0 %v4451_v3  ;;  %4294 = vmatprep.subr.bf16.mxu1 %v4451_v3 }
   0x2   :  { %v4289_v4 = vpack.c.bf16 %v16_v1, %v15_v0  ;;  %v18_v5 = vld [vmem:[%s5172_s1 + $0x18] sm:$0xff]  ;;  %3974 = vmatprep.mubr.msk.f32.mxu0 %vm4452_vm0, %v4453_v6  ;;  %3987 = vmatprep.mubr.msk.f32.mxu1 %vm4452_vm0, %v4453_v6  ;;  %v20_v8 = vld [vmem:[%s5172_s1 + $0x30] sm:$0xff] }
   0x3   :  { %v4292_v7 = vpack.c.bf16 %v18_v5, %v17_v2  ;;  %v21_v9 = vld [vmem:[%s5172_s1 + $0x38] sm:$0xff] }
   0x4   :  { %4290 = vmatpush3.bf16.msra.mxu0 %v4289_v4  ;;  %4296 = vmatpush3.bf16.msra.mxu1 %v4289_v4 }
   0x5   :  { %4291 = vmatprep.subr.bf16.mxu0 %v4451_v3  ;;  %4297 = vmatprep.subr.bf16.mxu1 %v4451_v3 }
   0x8   :  { %4293 = vmatpush3.bf16.msra.mxu0 %v4292_v7  ;;  %4299 = vmatpush3.bf16.msra.mxu1 %v4292_v7 }
   0x9   :  { %8 = vsyncpa [#allocation3], 0  ;;  %3972 = vmatprep.subr.mxu0 %v4453_v6  ;;  %3985 = vmatprep.subr.mxu1 %v4453_v6  ;;  %v19_v10 = vld [vmem:[%s5172_s1 + $0x20] sm:$0x1]  ;;  %vm60_vm1 = vcmask 1040384   ;;  %vm56_vm2 = vcmask 269312   ;;  %v4301_v13 = vpack.c.bf16 %v21_v9, %v20_v8 }
   0xa   :  { %v4518_v11 = vld [vmem:[%s5171_s0] sm:$0xff]  ;;  %v4523_v12 = vld [vmem:[%s5171_s0 + $0x8] sm:$0xff]  ;;  %v24_v19 = vld [vmem:[%s5172_s1 + $0x50] sm:$0x1]  ;;  %vm644_vm3 = vcmask 64512   ;;  %s4454_s4 = smov 120  }
   0xb   :  { %v22_v14 = vld [vmem:[%s5172_s1 + $0x40] sm:$0xff]  ;;  %v23_v15 = vld [vmem:[%s5172_s1 + $0x48] sm:$0xff]  ;;  %v27_v21 = vld [vmem:[%s5172_s1 + $0x70] sm:$0xff]  ;;  %s4455_s7 = smov 112   ;;  %s4456_s8 = smov 104   ;;  %vm3363_vm4 = vcmask 261120  }
   0xc   :  { %3973 = vmatpush3.msk.msra.mxu0 %vm60_vm1, %v19_v10  ;;  %3986 = vmatpush3.msk.msra.mxu1 %vm60_vm1, %v19_v10  ;;  %v4304_v16 = vpack.c.bf16 %v23_v15, %v22_v14  ;;  %v25_v17 = vld [vmem:[%s5172_s1 + $0x60] sm:$0xff]  ;;  %v26_v18 = vld [vmem:[%s5172_s1 + $0x68] sm:$0xff]  ;;  %v28_v22 = vld [vmem:[%s5172_s1 + $0x78] sm:$0xff]  ;;  %s4457_s9 = smov 96   ;;  %s4458_s10 = smov 88   ;;  %vm3563_vm5 = vcmask 523264  }
   0xd   :  { %3975 = vmatmul.mubr.msk.f32.vlgmr.msra.gmra.mrb[0].mxu0 %vm56_vm2, %v4518_v11  ;;  %3988 = vmatmul.mubr.msk.f32.vlgmr.msra.gmra.mrb[0].mxu1 %vm56_vm2, %v4523_v12  ;;  %v4313_v20 = vpack.c.bf16 %v26_v18, %v25_v17  ;;  %v4316_v23 = vpack.c.bf16 %v28_v22, %v27_v21  ;;  %v30_v24 = vld [vmem:[%s5172_s1 + $0x90] sm:$0xff]  ;;  %v31_v25 = vld [vmem:[%s5172_s1 + $0x98] sm:$0xff]  ;;  %v29_v26 = vld [vmem:[%s5172_s1 + $0x80] sm:$0x1]  ;;  %s4459_s11 = smov 80   ;;  %s4460_s12 = smov 72  }
   0xe   :  { %4300 = vmatprep.subr.bf16.mxu0 %v4451_v3  ;;  %4306 = vmatprep.subr.bf16.mxu1 %v4451_v3  ;;  %v4325_v27 = vpack.c.bf16 %v31_v25, %v30_v24  ;;  %v32_v28 = vld [vmem:[%s5172_s1 + $0xa0] sm:$0xff]  ;;  %v33_v29 = vld [vmem:[%s5172_s1 + $0xa8] sm:$0xff]  ;;  %v34_v31 = vld [vmem:[%s5172_s1 + $0xb0] sm:$0x1] }
   0xf   :  { %4302 = vmatpush3.bf16.msra.mxu0 %v4301_v13  ;;  %4308 = vmatpush3.bf16.msra.mxu1 %v4301_v13  ;;  %v4328_v30 = vpack.c.bf16 %v33_v29, %v32_v28  ;;  %v51_v32 = vld [vmem:[%s5173_s2 + $0x60] sm:$0xff]  ;;  %v52_v1 = vld [vmem:[%s5173_s2 + $0x68] sm:$0xff] }
  0x10   :  { %4303 = vmatprep.subr.bf16.mxu0 %v4451_v3  ;;  %4309 = vmatprep.subr.bf16.mxu1 %v4451_v3 }
  0x11   :  { %4000 = vmatprep.mubr.msk.f32.mxu0 %vm4452_vm0, %v4453_v6  ;;  %4013 = vmatprep.mubr.msk.f32.mxu1 %vm4452_vm0, %v4453_v6 }
  0x13   :  { %4305 = vmatpush3.bf16.msra.mxu0 %v4304_v16  ;;  %4311 = vmatpush3.bf16.msra.mxu1 %v4304_v16 }
  0x14   :  { %3998 = vmatprep.subr.mxu0 %v4453_v6  ;;  %4011 = vmatprep.subr.mxu1 %v4453_v6 }
  0x17   :  { %3999 = vmatpush3.msk.msra.mxu0 %vm60_vm1, %v24_v19  ;;  %4012 = vmatpush3.msk.msra.mxu1 %vm60_vm1, %v24_v19 }
  0x18   :  { %4001 = vmatmul.mubr.msk.f32.vlgmr.msra.gmra.mrb[2].mxu0 %vm56_vm2, %v4518_v11  ;;  %4312 = vmatprep.subr.bf16.mxu0 %v4451_v3 }
  0x19   :  { %4318 = vmatprep.subr.bf16.mxu1 %v4451_v3  ;;  %4014 = vmatmul.mubr.msk.f32.vlgmr.msra.gmra.mrb[2].mxu1 %vm56_vm2, %v4523_v12 }
  0x1a   :  { %4314 = vmatpush3.bf16.msra.mxu0 %v4313_v20  ;;  %4320 = vmatpush3.bf16.msra.mxu1 %v4313_v20 }
  0x1b   :  { %4315 = vmatprep.subr.bf16.mxu0 %v4451_v3  ;;  %4321 = vmatprep.subr.bf16.mxu1 %v4451_v3 }
  0x1c   :  { %4026 = vmatprep.mubr.msk.f32.mxu0 %vm4452_vm0, %v4453_v6  ;;  %4039 = vmatprep.mubr.msk.f32.mxu1 %vm4452_vm0, %v4453_v6 }
  0x1e   :  { %4317 = vmatpush3.bf16.msra.mxu0 %v4316_v23  ;;  %4323 = vmatpush3.bf16.msra.mxu1 %v4316_v23 }
  0x1f   :  { %4024 = vmatprep.subr.mxu0 %v4453_v6  ;;  %4037 = vmatprep.subr.mxu1 %v4453_v6 }
  0x22   :  { %4025 = vmatpush3.msk.msra.mxu0 %vm60_vm1, %v29_v26  ;;  %4038 = vmatpush3.msk.msra.mxu1 %vm60_vm1, %v29_v26 }
  0x23   :  { %4027 = vmatmul.mubr.msk.f32.vlgmr.msra.gmra.mrb[4].mxu0 %vm56_vm2, %v4518_v11  ;;  %4040 = vmatmul.mubr.msk.f32.vlgmr.msra.gmra.mrb[4].mxu1 %vm56_vm2, %v4523_v12 }
  0x24   :  { %4324 = vmatprep.subr.bf16.mxu0 %v4451_v3  ;;  %4330 = vmatprep.subr.bf16.mxu1 %v4451_v3 }
  0x25   :  { %4326 = vmatpush3.bf16.msra.mxu0 %v4325_v27  ;;  %4332 = vmatpush3.bf16.msra.mxu1 %v4325_v27 }
  0x26   :  { %4327 = vmatprep.subr.bf16.mxu0 %v4451_v3  ;;  %4333 = vmatprep.subr.bf16.mxu1 %v4451_v3 }
  0x27   :  { %4052 = vmatprep.mubr.msk.f32.mxu0 %vm4452_vm0, %v4453_v6  ;;  %4065 = vmatprep.mubr.msk.f32.mxu1 %vm4452_vm0, %v4453_v6 }
  0x29   :  { %4329 = vmatpush3.bf16.msra.mxu0 %v4328_v30  ;;  %4335 = vmatpush3.bf16.msra.mxu1 %v4328_v30 }
  0x2a   :  { %4050 = vmatprep.subr.mxu0 %v4453_v6  ;;  %4063 = vmatprep.subr.mxu1 %v4453_v6 }
  0x2d   :  { %4051 = vmatpush3.msk.msra.mxu0 %vm60_vm1, %v34_v31  ;;  %4064 = vmatpush3.msk.msra.mxu1 %vm60_vm1, %v34_v31 }
  0x2e   :  { %4053 = vmatmul.mubr.msk.f32.vlgmr.msra.gmra.mrb[6].mxu0 %vm56_vm2, %v4518_v11  ;;  %4066 = vmatmul.mubr.msk.f32.vlgmr.msra.gmra.mrb[6].mxu1 %vm56_vm2, %v4523_v12 }
  0x2f   :  { %4068 = vmatprep.subr.mxu0 %v4453_v6  ;;  %4073 = vmatprep.subr.mxu1 %v4453_v6 }
  0x30   :  { %4069 = vmatpush3.msra.mxu0 %v51_v32  ;;  %4070 = vmatprep.mubr.msk.f32.mxu0 %vm4452_vm0, %v4453_v6 }
  0x31   :  { %4074 = vmatpush3.msra.mxu1 %v51_v32  ;;  %4075 = vmatprep.mubr.msk.f32.mxu1 %vm4452_vm0, %v4453_v6 }
  0x32   :  { %4078 = vmatprep.subr.mxu0 %v4453_v6  ;;  %4083 = vmatprep.subr.mxu1 %v4453_v6 }
  0xe0   :  { %v4629_v33 = vpop.f32.mrb[0].mxu0  ;;  %v4631_v34 = vpop.f32.mrb[0].mxu1 }
  0xe1   :  { %v4634_v35 = vmul.f32 0.35355338, %v4629_v33  ;;  %v4637_v36 = vmul.f32 0.35355338, %v4631_v34  ;;  %1470 = vrot.lane.b32.xlu0 %v4629_v33, %s4454_s4  ;;  %v3976_v37 = vpop.f32.mrb[1].mxu0  ;;  %v3989_v38 = vpop.f32.mrb[1].mxu1 }
  0xe3   :  { %4071 = vmatmul.mubr.msk.f32.vlgmr.msra.gmra.mrb[8].mxu0 %vm644_vm3, %v4634_v35  ;;  %4076 = vmatmul.mubr.msk.f32.vlgmr.msra.gmra.mrb[8].mxu1 %vm644_vm3, %v4637_v36 }
  0xe4   :  { %4079 = vmatpush3.msra.mxu0 %v51_v32  ;;  %4080 = vmatprep.mubr.msk.f32.mxu0 %vm4452_vm0, %v4453_v6 }
  0xe5   :  { %1545 = vrot.lane.b32.xlu0 %v4631_v34, %s4454_s4  ;;  %4084 = vmatpush3.msra.mxu1 %v51_v32 }
  0xe6   :  { %4085 = vmatprep.mubr.msk.f32.mxu1 %vm4452_vm0, %v4453_v6  ;;  %4088 = vmatprep.subr.mxu0 %v4453_v6 }
  0xe7   :  { %4093 = vmatprep.subr.mxu1 %v4453_v6 }
  0xeb   :  { %v4653_v39 = vpop.f32.mrb[2].mxu0 }
  0xec   :  { %v638_v40 = vmul.f32 0.35355338, %v4653_v39  ;;  %1620 = vrot.lane.b32.xlu1 %v4653_v39, %s4454_s4  ;;  %v4658_v41 = vpop.f32.mrb[2].mxu1  ;;  %v4002_v42 = vpop.f32.mrb[3].mxu0 }
  0xed   :  { %v639_v43 = vmul.f32 0.35355338, %v4658_v41  ;;  %v4015_v44 = vpop.f32.mrb[3].mxu1 }
  0xee   :  { %4081 = vmatmul.mubr.msk.f32.vlgmr.msra.gmra.mrb[10].mxu0 %vm644_vm3, %v638_v40 }
  0xef   :  { %4086 = vmatmul.mubr.msk.f32.vlgmr.msra.gmra.mrb[10].mxu1 %vm644_vm3, %v639_v43  ;;  %4089 = vmatpush3.msra.mxu0 %v51_v32 }
  0xf0   :  { %1695 = vrot.lane.b32.xlu1 %v4658_v41, %s4454_s4  ;;  %4090 = vmatprep.mubr.msk.f32.mxu0 %vm4452_vm0, %v4453_v6 }
  0xf1   :  { %4094 = vmatpush3.msra.mxu1 %v51_v32  ;;  %4095 = vmatprep.mubr.msk.f32.mxu1 %vm4452_vm0, %v4453_v6 }
  0xf2   :  { %4098 = vmatprep.subr.mxu0 %v4453_v6  ;;  %4103 = vmatprep.subr.mxu1 %v4453_v6 }
  0xf6   :  { %v4671_v45 = vpop.f32.mrb[4].mxu0  ;;  %v4673_v46 = vpop.f32.mrb[4].mxu1 }
  0xf7   :  { %v640_v47 = vmul.f32 0.35355338, %v4671_v45  ;;  %v641_v48 = vmul.f32 0.35355338, %v4673_v46  ;;  %1845 = vrot.lane.b32.xlu1 %v4673_v46, %s4454_s4  ;;  %1770 = vrot.lane.b32.xlu0 %v4671_v45, %s4454_s4  ;;  %v4028_v49 = vpop.f32.mrb[5].mxu0  ;;  %v4041_v50 = vpop.f32.mrb[5].mxu1 }
  0xf9   :  { %4091 = vmatmul.mubr.msk.f32.vlgmr.msra.gmra.mrb[12].mxu0 %vm644_vm3, %v640_v47  ;;  %4096 = vmatmul.mubr.msk.f32.vlgmr.msra.gmra.mrb[12].mxu1 %vm644_vm3, %v641_v48 }
  0xfa   :  { %4099 = vmatpush3.msra.mxu0 %v51_v32  ;;  %4100 = vmatprep.mubr.msk.f32.mxu0 %vm4452_vm0, %v4453_v6 }
  0xfb   :  { %4104 = vmatpush3.msra.mxu1 %v51_v32  ;;  %4105 = vmatprep.mubr.msk.f32.mxu1 %vm4452_vm0, %v4453_v6 }
  0xfc   :  { %4108 = vmatprep.subr.mxu0 %v4453_v6  ;;  %4113 = vmatprep.subr.mxu1 %v4453_v6 }
 0x101   :  { %v4689_v51 = vpop.f32.mrb[6].mxu0  ;;  %v4691_v52 = vpop.f32.mrb[6].mxu1 }
 0x102   :  { %v642_v53 = vmul.f32 0.35355338, %v4689_v51  ;;  %v643_v54 = vmul.f32 0.35355338, %v4691_v52  ;;  %1995 = vrot.lane.b32.xlu1 %v4691_v52, %s4454_s4  ;;  %1920 = vrot.lane.b32.xlu0 %v4689_v51, %s4454_s4  ;;  %v4054_v55 = vpop.f32.mrb[7].mxu0  ;;  %v4067_v56 = vpop.f32.mrb[7].mxu1 }
 0x104   :  { %4101 = vmatmul.mubr.msk.f32.vlgmr.msra.gmra.mrb[14].mxu0 %vm644_vm3, %v642_v53  ;;  %4106 = vmatmul.mubr.msk.f32.vlgmr.msra.gmra.mrb[14].mxu1 %vm644_vm3, %v643_v54 }
 0x105   :  { %4110 = vmatprep.mubr.msk.f32.mxu0 %vm4452_vm0, %v4453_v6  ;;  %4115 = vmatprep.mubr.msk.f32.mxu1 %vm4452_vm0, %v4453_v6 }
 0x153   :  { %v1471_v57 = vpop.permute.xlu0 %1470 }
 0x154   :  { %4109 = vmatpush3.xpose.msk.msra.mxu0 %vm644_vm3, %v1471_v57 }
 0x155   :  { %4118 = vmatprep.subr.mxu0 %v4453_v6 }
 0x157   :  { %v1546_v58 = vpop.permute.xlu0 %1545  ;;  %4111 = vmatmul.mubr.msk.f32.vlgmr.msra.gmra.mrb[16].mxu0 %vm644_vm3, %v4634_v35 }
 0x158   :  { %4114 = vmatpush3.xpose.msk.msra.mxu1 %vm644_vm3, %v1546_v58  ;;  %4120 = vmatprep.mubr.msk.f32.mxu0 %vm4452_vm0, %v4453_v6 }
 0x159   :  { %4123 = vmatprep.subr.mxu1 %v4453_v6 }
 0x15b   :  { %4116 = vmatmul.mubr.msk.f32.vlgmr.msra.gmra.mrb[16].mxu1 %vm644_vm3, %v4637_v36 }
 0x15c   :  { %4125 = vmatprep.mubr.msk.f32.mxu1 %vm4452_vm0, %v4453_v6 }
 0x15e   :  { %v1621_v59 = vpop.permute.xlu1 %1620 }
 0x15f   :  { %4119 = vmatpush3.xpose.msk.msra.mxu0 %vm644_vm3, %v1621_v59 }
 0x160   :  { %4128 = vmatprep.subr.mxu0 %v4453_v6 }
 0x162   :  { %v1696_v60 = vpop.permute.xlu1 %1695  ;;  %4121 = vmatmul.mubr.msk.f32.vlgmr.msra.gmra.mrb[18].mxu0 %vm644_vm3, %v638_v40 }
 0x163   :  { %4124 = vmatpush3.xpose.msk.msra.mxu1 %vm644_vm3, %v1696_v60  ;;  %4130 = vmatprep.mubr.msk.f32.mxu0 %vm4452_vm0, %v4453_v6 }
 0x164   :  { %4133 = vmatprep.subr.mxu1 %v4453_v6 }
 0x166   :  { %4126 = vmatmul.mubr.msk.f32.vlgmr.msra.gmra.mrb[18].mxu1 %vm644_vm3, %v639_v43 }
 0x167   :  { %4135 = vmatprep.mubr.msk.f32.mxu1 %vm4452_vm0, %v4453_v6 }
 0x169   :  { %v1846_v61 = vpop.permute.xlu1 %1845  ;;  %v1771_v62 = vpop.permute.xlu0 %1770 }
 0x16a   :  { %4129 = vmatpush3.xpose.msk.msra.mxu0 %vm644_vm3, %v1771_v62  ;;  %4134 = vmatpush3.xpose.msk.msra.mxu1 %vm644_vm3, %v1846_v61 }
 0x16b   :  { %4143 = vmatprep.subr.mxu1 %v4453_v6  ;;  %4138 = vmatprep.subr.mxu0 %v4453_v6 }
 0x16d   :  { %4131 = vmatmul.mubr.msk.f32.vlgmr.msra.gmra.mrb[20].mxu0 %vm644_vm3, %v640_v47  ;;  %4136 = vmatmul.mubr.msk.f32.vlgmr.msra.gmra.mrb[20].mxu1 %vm644_vm3, %v641_v48 }
 0x16e   :  { %4140 = vmatprep.mubr.msk.f32.mxu0 %vm4452_vm0, %v4453_v6  ;;  %4145 = vmatprep.mubr.msk.f32.mxu1 %vm4452_vm0, %v4453_v6 }
 0x174   :  { %v1996_v63 = vpop.permute.xlu1 %1995  ;;  %v1921_v0 = vpop.permute.xlu0 %1920 }
 0x175   :  { %4139 = vmatpush3.xpose.msk.msra.mxu0 %vm644_vm3, %v1921_v0  ;;  %4144 = vmatpush3.xpose.msk.msra.mxu1 %vm644_vm3, %v1996_v63 }
 0x176   :  { %4148 = vmatprep.subr.mxu0 %v4453_v6  ;;  %4153 = vmatprep.subr.mxu1 %v4453_v6 }
 0x178   :  { %4141 = vmatmul.mubr.msk.f32.vlgmr.msra.gmra.mrb[22].mxu0 %vm644_vm3, %v642_v53  ;;  %4146 = vmatmul.mubr.msk.f32.vlgmr.msra.gmra.mrb[22].mxu1 %vm644_vm3, %v643_v54 }
 0x179   :  { %4150 = vmatprep.mubr.msk.f32.mxu0 %vm4452_vm0, %v4453_v6  ;;  %4155 = vmatprep.mubr.msk.f32.mxu1 %vm4452_vm0, %v4453_v6 }
 0x1b6   :  { %v714_v2 = vpop.f32.mrb[8].mxu0  ;;  %v787_v4 = vpop.f32.mrb[8].mxu1 }
 0x1b7   :  { %v4750_v5 = vmul.f32 %v714_v2, %v52_v1  ;;  %v4752_v7 = vmul.f32 %v787_v4, %v52_v1  ;;  %v4072_v8 = vpop.f32.mrb[9].mxu0  ;;  %v4077_v9 = vpop.f32.mrb[9].mxu1 }
 0x1b9   :  { %1247 = vrot.lane.b32.xlu1 %v4752_v7, %s4454_s4  ;;  %1245 = vrot.lane.b32.xlu0 %v4750_v5, %s4454_s4 }
 0x1bd   :  { %1279 = vrot.lane.b32.xlu1 %v4752_v7, %s4455_s7  ;;  %1277 = vrot.lane.b32.xlu0 %v4750_v5, %s4455_s7 }
 0x1c1   :  { %1311 = vrot.lane.b32.xlu1 %v4752_v7, %s4456_s8  ;;  %1309 = vrot.lane.b32.xlu0 %v4750_v5, %s4456_s8  ;;  %v860_v10 = vpop.f32.mrb[10].mxu0 }
 0x1c2   :  { %v4082_v11 = vpop.f32.mrb[11].mxu0  ;;  %v933_v12 = vpop.f32.mrb[10].mxu1  ;;  %v4782_v18 = vmul.f32 %v860_v10, %v52_v1 }
 0x1c3   :  { %v4087_v13 = vpop.f32.mrb[11].mxu1  ;;  %v4784_v19 = vmul.f32 %v933_v12, %v52_v1 }
 0x1c5   :  { %1343 = vrot.lane.b32.xlu1 %v4752_v7, %s4457_s9  ;;  %1341 = vrot.lane.b32.xlu0 %v4750_v5, %s4457_s9 }
 0x1c9   :  { %1375 = vrot.lane.b32.xlu1 %v4752_v7, %s4458_s10  ;;  %1373 = vrot.lane.b32.xlu0 %v4750_v5, %s4458_s10 }
 0x1cc   :  { %v1006_v14 = vpop.f32.mrb[12].mxu0  ;;  %v1079_v15 = vpop.f32.mrb[12].mxu1 }
 0x1cd   :  { %1407 = vrot.lane.b32.xlu1 %v4752_v7, %s4459_s11  ;;  %1405 = vrot.lane.b32.xlu0 %v4750_v5, %s4459_s11  ;;  %v4092_v16 = vpop.f32.mrb[13].mxu0  ;;  %v4097_v17 = vpop.f32.mrb[13].mxu1  ;;  %v4818_v26 = vmul.f32 %v1006_v14, %v52_v1  ;;  %v4820_v27 = vmul.f32 %v1079_v15, %v52_v1 }
 0x1d1   :  { %1439 = vrot.lane.b32.xlu1 %v4752_v7, %s4460_s12  ;;  %1437 = vrot.lane.b32.xlu0 %v4750_v5, %s4460_s12 }
 0x1d5   :  { %1251 = vrot.lane.b32.xlu1 %v4784_v19, %s4454_s4  ;;  %1249 = vrot.lane.b32.xlu0 %v4782_v18, %s4454_s4 }
 0x1d7   :  { %v1152_v20 = vpop.f32.mrb[14].mxu0  ;;  %v1225_v21 = vpop.f32.mrb[14].mxu1 }
 0x1d8   :  { %v4790_v22 = vmul.f32 %v1152_v20, %v52_v1  ;;  %v4102_v23 = vpop.f32.mrb[15].mxu0  ;;  %v4792_v24 = vmul.f32 %v1225_v21, %v52_v1  ;;  %v4107_v25 = vpop.f32.mrb[15].mxu1 }
 0x1d9   :  { %1283 = vrot.lane.b32.xlu1 %v4784_v19, %s4455_s7  ;;  %1281 = vrot.lane.b32.xlu0 %v4782_v18, %s4455_s7 }
 0x1dd   :  { %1315 = vrot.lane.b32.xlu1 %v4784_v19, %s4456_s8  ;;  %1313 = vrot.lane.b32.xlu0 %v4782_v18, %s4456_s8 }
 0x1e1   :  { %1347 = vrot.lane.b32.xlu1 %v4784_v19, %s4457_s9  ;;  %1345 = vrot.lane.b32.xlu0 %v4782_v18, %s4457_s9 }
 0x1e5   :  { %1379 = vrot.lane.b32.xlu1 %v4784_v19, %s4458_s10  ;;  %1377 = vrot.lane.b32.xlu0 %v4782_v18, %s4458_s10 }
 0x1e9   :  { %1411 = vrot.lane.b32.xlu1 %v4784_v19, %s4459_s11  ;;  %1409 = vrot.lane.b32.xlu0 %v4782_v18, %s4459_s11 }
 0x1ed   :  { %1443 = vrot.lane.b32.xlu1 %v4784_v19, %s4460_s12  ;;  %1441 = vrot.lane.b32.xlu0 %v4782_v18, %s4460_s12 }
 0x1f1   :  { %1255 = vrot.lane.b32.xlu1 %v4820_v27, %s4454_s4  ;;  %1253 = vrot.lane.b32.xlu0 %v4818_v26, %s4454_s4 }
 0x1f5   :  { %1287 = vrot.lane.b32.xlu1 %v4820_v27, %s4455_s7  ;;  %1285 = vrot.lane.b32.xlu0 %v4818_v26, %s4455_s7 }
 0x1f9   :  { %1319 = vrot.lane.b32.xlu1 %v4820_v27, %s4456_s8  ;;  %1317 = vrot.lane.b32.xlu0 %v4818_v26, %s4456_s8 }
 0x1fd   :  { %1351 = vrot.lane.b32.xlu1 %v4820_v27, %s4457_s9  ;;  %1349 = vrot.lane.b32.xlu0 %v4818_v26, %s4457_s9 }
 0x201   :  { %1383 = vrot.lane.b32.xlu1 %v4820_v27, %s4458_s10  ;;  %1381 = vrot.lane.b32.xlu0 %v4818_v26, %s4458_s10 }
 0x205   :  { %1415 = vrot.lane.b32.xlu1 %v4820_v27, %s4459_s11  ;;  %1413 = vrot.lane.b32.xlu0 %v4818_v26, %s4459_s11 }
 0x209   :  { %1447 = vrot.lane.b32.xlu1 %v4820_v27, %s4460_s12  ;;  %1445 = vrot.lane.b32.xlu0 %v4818_v26, %s4460_s12 }
 0x20d   :  { %1259 = vrot.lane.b32.xlu1 %v4792_v24, %s4454_s4  ;;  %1257 = vrot.lane.b32.xlu0 %v4790_v22, %s4454_s4 }
 0x211   :  { %1291 = vrot.lane.b32.xlu1 %v4792_v24, %s4455_s7  ;;  %1289 = vrot.lane.b32.xlu0 %v4790_v22, %s4455_s7 }
 0x215   :  { %1323 = vrot.lane.b32.xlu1 %v4792_v24, %s4456_s8  ;;  %1321 = vrot.lane.b32.xlu0 %v4790_v22, %s4456_s8 }
 0x219   :  { %1355 = vrot.lane.b32.xlu1 %v4792_v24, %s4457_s9  ;;  %1353 = vrot.lane.b32.xlu0 %v4790_v22, %s4457_s9 }
 0x21d   :  { %1387 = vrot.lane.b32.xlu1 %v4792_v24, %s4458_s10  ;;  %1385 = vrot.lane.b32.xlu0 %v4790_v22, %s4458_s10 }
 0x221   :  { %1419 = vrot.lane.b32.xlu1 %v4792_v24, %s4459_s11  ;;  %1417 = vrot.lane.b32.xlu0 %v4790_v22, %s4459_s11 }
 0x225   :  { %1451 = vrot.lane.b32.xlu1 %v4792_v24, %s4460_s12  ;;  %1449 = vrot.lane.b32.xlu0 %v4790_v22, %s4460_s12 }
 0x22a   :  { %v1540_v28 = vpop.f32.mrb[16].mxu0 }
 0x22b   :  { %v1248_v29 = vpop.permute.xlu1 %1247  ;;  %v1246_v30 = vpop.permute.xlu0 %1245 }
 0x22c   :  { %v4112_v31 = vpop.f32.mrb[17].mxu0  ;;  %v1270_v47 = vadd.f32 %v1248_v29, %v4752_v7  ;;  %v1269_v50 = vadd.f32 %v1246_v30, %v4750_v5 }
 0x22e   :  { %v1615_v32 = vpop.f32.mrb[16].mxu1 }
 0x22f   :  { %v4117_v35 = vpop.f32.mrb[17].mxu1  ;;  %v1280_v36 = vpop.permute.xlu1 %1279 }
 0x230   :  { %v1278_v37 = vpop.permute.xlu0 %1277  ;;  %v1302_v53 = vadd.f32 %v1280_v36, %v1270_v47 }
 0x231   :  { %v1301_v56 = vadd.f32 %v1278_v37, %v1269_v50 }
 0x233   :  { %v1312_v38 = vpop.permute.xlu1 %1311 }
 0x234   :  { %v1310_v40 = vpop.permute.xlu0 %1309  ;;  %v1334_v57 = vadd.f32 %v1312_v38, %v1302_v53 }
 0x235   :  { %v4878_v42 = vpop.f32.mrb[18].mxu0  ;;  %v1333_v59 = vadd.f32 %v1310_v40, %v1301_v56 }
 0x236   :  { %v4122_v43 = vpop.f32.mrb[19].mxu0 }
 0x237   :  { %v1344_v44 = vpop.permute.xlu1 %1343 }
 0x238   :  { %v1342_v48 = vpop.permute.xlu0 %1341  ;;  %v1366_v60 = vadd.f32 %v1344_v44, %v1334_v57 }
 0x239   :  { %v4881_v49 = vpop.f32.mrb[18].mxu1  ;;  %v1365_v62 = vadd.f32 %v1342_v48, %v1333_v59 }
 0x23a   :  { %v4127_v54 = vpop.f32.mrb[19].mxu1 }
 0x23b   :  { %v1376_v55 = vpop.permute.xlu1 %1375 }
 0x23c   :  { %v1374_v58 = vpop.permute.xlu0 %1373  ;;  %v1398_v63 = vadd.f32 %v1376_v55, %v1366_v60 }
 0x23d   :  { %v1397_v7 = vadd.f32 %v1374_v58, %v1365_v62 }
 0x23f   :  { %v1408_v61 = vpop.permute.xlu1 %1407 }
 0x240   :  { %v4884_v0 = vpop.f32.mrb[20].mxu0  ;;  %v4886_v1 = vpop.f32.mrb[20].mxu1  ;;  %v1430_v8 = vadd.f32 %v1408_v61, %v1398_v63 }
 0x241   :  { %v4137_v2 = vpop.f32.mrb[21].mxu1  ;;  %v1406_v4 = vpop.permute.xlu0 %1405 }
 0x242   :  { %v4132_v5 = vpop.f32.mrb[21].mxu0  ;;  %v1429_v10 = vadd.f32 %v1406_v4, %v1397_v7 }
 0x243   :  { %v1440_v9 = vpop.permute.xlu1 %1439 }
 0x244   :  { %v1462_v11 = vadd.f32 %v1440_v9, %v1430_v8 }
 0x245   :  { %v1438_v12 = vpop.permute.xlu0 %1437 }
 0x246   :  { %v1461_v13 = vadd.f32 %v1438_v12, %v1429_v10  ;;  %v4888_v14 = vadd.f32 %v1615_v32, %v1462_v11 }
 0x247   :  { %v1252_v15 = vpop.permute.xlu1 %1251 }
 0x248   :  { %v2072_v16 = vsel %vm644_vm3, %v4888_v14, -inf  ;;  %v4892_v17 = vadd.f32 %v1540_v28, %v1461_v13  ;;  %v1272_v28 = vadd.f32 %v1252_v15, %v4784_v19 }
 0x249   :  { %v1250_v20 = vpop.permute.xlu0 %1249  ;;  %2073 = vmax.xlane.f32.xlu1 %v2072_v16 }
 0x24a   :  { %v2069_v21 = vsel %vm644_vm3, %v4892_v17, -inf  ;;  %v1271_v40 = vadd.f32 %v1250_v20, %v4782_v18 }
 0x24b   :  { %v4896_v23 = vpop.f32.mrb[22].mxu0  ;;  %v4898_v25 = vpop.f32.mrb[22].mxu1  ;;  %2070 = vmax.xlane.f32.xlu0 %v2069_v21 }
 0x24c   :  { %v4147_v29 = vpop.f32.mrb[23].mxu1  ;;  %v4142_v30 = vpop.f32.mrb[23].mxu0 }
 0x24d   :  { %v1284_v31 = vpop.permute.xlu1 %1283  ;;  %v1282_v32 = vpop.permute.xlu0 %1281 }
 0x24e   :  { %v1304_v43 = vadd.f32 %v1284_v31, %v1272_v28  ;;  %v1303_v44 = vadd.f32 %v1282_v32, %v1271_v40 }
 0x251   :  { %v1316_v35 = vpop.permute.xlu1 %1315  ;;  %v1314_v36 = vpop.permute.xlu0 %1313 }
 0x252   :  { %v1336_v50 = vadd.f32 %v1316_v35, %v1304_v43  ;;  %v1335_v53 = vadd.f32 %v1314_v36, %v1303_v44 }
 0x255   :  { %v1348_v37 = vpop.permute.xlu1 %1347  ;;  %v1346_v38 = vpop.permute.xlu0 %1345 }
 0x256   :  { %v1368_v54 = vadd.f32 %v1348_v37, %v1336_v50  ;;  %v1367_v55 = vadd.f32 %v1346_v38, %v1335_v53 }
 0x259   :  { %v1380_v47 = vpop.permute.xlu1 %1379  ;;  %v1378_v48 = vpop.permute.xlu0 %1377 }
 0x25a   :  { %v1400_v58 = vadd.f32 %v1380_v47, %v1368_v54  ;;  %v1399_v59 = vadd.f32 %v1378_v48, %v1367_v55 }
 0x25d   :  { %v1412_v56 = vpop.permute.xlu1 %1411  ;;  %v1410_v57 = vpop.permute.xlu0 %1409 }
 0x25e   :  { %v1432_v60 = vadd.f32 %v1412_v56, %v1400_v58  ;;  %v1431_v61 = vadd.f32 %v1410_v57, %v1399_v59 }
 0x261   :  { %v1444_v62 = vpop.permute.xlu1 %1443  ;;  %v1442_v63 = vpop.permute.xlu0 %1441 }
 0x262   :  { %v1464_v2 = vadd.f32 %v1444_v62, %v1432_v60  ;;  %v1463_v19 = vadd.f32 %v1442_v63, %v1431_v61 }
 0x264   :  { %v4903_v18 = vadd.f32 %v4878_v42, %v1463_v19  ;;  %v4908_v5 = vadd.f32 %v4881_v49, %v1464_v2 }
 0x265   :  { %v1256_v4 = vpop.permute.xlu1 %1255  ;;  %v1254_v7 = vpop.permute.xlu0 %1253 }
 0x266   :  { %v2075_v8 = vsel %vm644_vm3, %v4903_v18, -inf  ;;  %v2078_v11 = vsel %vm644_vm3, %v4908_v5, -inf  ;;  %v1274_v16 = vadd.f32 %v1256_v4, %v4820_v27  ;;  %v1273_v20 = vadd.f32 %v1254_v7, %v4818_v26 }
 0x267   :  { %2076 = vmax.xlane.f32.xlu0 %v2075_v8 }
 0x269   :  { %v1288_v9 = vpop.permute.xlu1 %1287  ;;  %v1286_v10 = vpop.permute.xlu0 %1285 }
 0x26a   :  { %v1306_v21 = vadd.f32 %v1288_v9, %v1274_v16  ;;  %v1305_v29 = vadd.f32 %v1286_v10, %v1273_v20 }
 0x26b   :  { %2079 = vmax.xlane.f32.xlu0 %v2078_v11 }
 0x26d   :  { %v1320_v12 = vpop.permute.xlu1 %1319  ;;  %v1318_v13 = vpop.permute.xlu0 %1317 }
 0x26e   :  { %v1338_v31 = vadd.f32 %v1320_v12, %v1306_v21  ;;  %v1337_v32 = vadd.f32 %v1318_v13, %v1305_v29 }
 0x271   :  { %v1352_v15 = vpop.permute.xlu1 %1351  ;;  %v1350_v42 = vpop.permute.xlu0 %1349 }
 0x272   :  { %v1370_v35 = vadd.f32 %v1352_v15, %v1338_v31  ;;  %v1369_v36 = vadd.f32 %v1350_v42, %v1337_v32 }
 0x275   :  { %v1384_v30 = vpop.permute.xlu1 %1383  ;;  %v1382_v49 = vpop.permute.xlu0 %1381 }
 0x276   :  { %v1402_v28 = vadd.f32 %v1384_v30, %v1370_v35  ;;  %v1401_v40 = vadd.f32 %v1382_v49, %v1369_v36 }
 0x279   :  { %v1416_v37 = vpop.permute.xlu1 %1415  ;;  %v1414_v38 = vpop.permute.xlu0 %1413 }
 0x27a   :  { %v1434_v43 = vadd.f32 %v1416_v37, %v1402_v28  ;;  %v1433_v44 = vadd.f32 %v1414_v38, %v1401_v40 }
 0x27d   :  { %v1448_v47 = vpop.permute.xlu1 %1447  ;;  %v1446_v48 = vpop.permute.xlu0 %1445 }
 0x27e   :  { %v1466_v50 = vadd.f32 %v1448_v47, %v1434_v43  ;;  %v1465_v27 = vadd.f32 %v1446_v48, %v1433_v44 }
 0x280   :  { %v4915_v26 = vadd.f32 %v4886_v1, %v1466_v50  ;;  %v4918_v53 = vadd.f32 %v4884_v0, %v1465_v27 }
 0x281   :  { %v1260_v54 = vpop.permute.xlu1 %1259  ;;  %v1258_v55 = vpop.permute.xlu0 %1257 }
 0x282   :  { %v2084_v56 = vsel %vm644_vm3, %v4915_v26, -inf  ;;  %v2081_v57 = vsel %vm644_vm3, %v4918_v53, -inf  ;;  %v1276_v63 = vadd.f32 %v1260_v54, %v4792_v24  ;;  %v1275_v0 = vadd.f32 %v1258_v55, %v4790_v22 }
 0x283   :  { %2085 = vmax.xlane.f32.xlu0 %v2084_v56  ;;  %2082 = vmax.xlane.f32.xlu1 %v2081_v57 }
 0x285   :  { %v1292_v58 = vpop.permute.xlu1 %1291  ;;  %v1290_v59 = vpop.permute.xlu0 %1289 }
 0x286   :  { %v1308_v2 = vadd.f32 %v1292_v58, %v1276_v63  ;;  %v1307_v19 = vadd.f32 %v1290_v59, %v1275_v0 }
 0x289   :  { %v1324_v60 = vpop.permute.xlu1 %1323  ;;  %v1322_v61 = vpop.permute.xlu0 %1321 }
 0x28a   :  { %v1340_v8 = vadd.f32 %v1324_v60, %v1308_v2  ;;  %v1339_v9 = vadd.f32 %v1322_v61, %v1307_v19 }
 0x28d   :  { %v1356_v62 = vpop.permute.xlu1 %1355  ;;  %v1354_v1 = vpop.permute.xlu0 %1353 }
 0x28e   :  { %v1372_v10 = vadd.f32 %v1356_v62, %v1340_v8  ;;  %v1371_v11 = vadd.f32 %v1354_v1, %v1339_v9 }
 0x291   :  { %v1388_v4 = vpop.permute.xlu1 %1387  ;;  %v1386_v7 = vpop.permute.xlu0 %1385 }
 0x292   :  { %v1404_v15 = vadd.f32 %v1388_v4, %v1372_v10  ;;  %v1403_v42 = vadd.f32 %v1386_v7, %v1371_v11 }
 0x295   :  { %v1420_v12 = vpop.permute.xlu1 %1419  ;;  %v1418_v13 = vpop.permute.xlu0 %1417 }
 0x296   :  { %v1436_v16 = vadd.f32 %v1420_v12, %v1404_v15  ;;  %v1435_v20 = vadd.f32 %v1418_v13, %v1403_v42 }
 0x299   :  { %v1452_v21 = vpop.permute.xlu1 %1451  ;;  %v1450_v29 = vpop.permute.xlu0 %1449 }
 0x29a   :  { %v1468_v30 = vadd.f32 %v1452_v21, %v1436_v16  ;;  %v1467_v24 = vadd.f32 %v1450_v29, %v1435_v20 }
 0x29c   :  { %v2066_v22 = vadd.f32 %v4898_v25, %v1468_v30  ;;  %v1991_v49 = vadd.f32 %v4896_v23, %v1467_v24 }
 0x29e   :  { %v2090_v31 = vsel %vm644_vm3, %v2066_v22, -inf  ;;  %v2087_v32 = vsel %vm644_vm3, %v1991_v49, -inf }
 0x29f   :  { %2091 = vmax.xlane.f32.xlu0 %v2090_v31  ;;  %2088 = vmax.xlane.f32.xlu1 %v2087_v32 }
 0x2b0   :  { %2157 = vrot.lane.b32.xlu1 %v4629_v33, %s4455_s7 }
 0x2b4   :  { %2309 = vrot.lane.b32.xlu1 %v4653_v39, %s4455_s7 }
 0x2b5   :  { %2233 = vrot.lane.b32.xlu0 %v4631_v34, %s4455_s7 }
 0x2b8   :  { %2385 = vrot.lane.b32.xlu1 %v4658_v41, %s4455_s7 }
 0x2b9   :  { %2461 = vrot.lane.b32.xlu0 %v4671_v45, %s4455_s7 }
 0x2bc   :  { %2537 = vrot.lane.b32.xlu1 %v4673_v46, %s4455_s7 }
 0x2d6   :  { %v2074_v23 = vpop.xlane.xlu1 %2073 }
 0x2d7   :  { %v2094_v25 = vsub.f32 %v4888_v14, %v2074_v23 }
 0x2d8   :  { %v2071_v35 = vpop.xlane.xlu0 %2070 }
 0x2d9   :  { %v2103_v33 = vmul.f32 1.442695, %v2094_v25  ;;  %v2093_v36 = vsub.f32 %v4892_v17, %v2071_v35 }
 0x2db   :  { %4385 = vpow2.f32 %v2103_v33  ;;  %v2101_v39 = vmul.f32 1.442695, %v2093_v36 }
 0x2dd   :  { %4387 = vpow2.f32 %v2101_v39 }
 0x2e5   :  { %v4944_v34 = vpop.eup %4385 }
 0x2e6   :  { %v2120_v41 = vsel %vm644_vm3, %v4944_v34, 0.0 }
 0x2e7   :  { %v4948_v37 = vpop.eup %4387  ;;  %2121 = vadd.xlane.f32.xlu0 %v2120_v41 }
 0x2e8   :  { %v2117_v45 = vsel %vm644_vm3, %v4948_v37, 0.0 }
 0x2e9   :  { %2118 = vadd.xlane.f32.xlu1 %v2117_v45 }
 0x2f4   :  { %v2077_v46 = vpop.xlane.xlu0 %2076 }
 0x2f5   :  { %v2095_v14 = vsub.f32 %v4903_v18, %v2077_v46  ;;  %v35_v46 = vld [vmem:[%s5172_s1 + $0x28] sm:$0xff] }
 0x2f7   :  { %v2105_v38 = vmul.f32 1.442695, %v2095_v14 }
 0x2f8   :  { %v2080_v17 = vpop.xlane.xlu0 %2079 }
 0x2f9   :  { %4389 = vpow2.f32 %v2105_v38  ;;  %v2096_v28 = vsub.f32 %v4908_v5, %v2080_v17  ;;  %v36_v17 = vld [vmem:[%s5172_s1 + $0x58] sm:$0xff] }
 0x2fb   :  { %v2107_v40 = vmul.f32 1.442695, %v2096_v28 }
 0x2fd   :  { %4391 = vpow2.f32 %v2107_v40 }
 0x303   :  { %v4954_v43 = vpop.eup %4389 }
 0x304   :  { %v2123_v44 = vsel %vm644_vm3, %v4954_v43, 0.0 }
 0x305   :  { %2124 = vadd.xlane.f32.xlu1 %v2123_v44 }
 0x307   :  { %v4958_v47 = vpop.eup %4391 }
 0x308   :  { %v2126_v48 = vsel %vm644_vm3, %v4958_v47, 0.0 }
 0x309   :  { %2127 = vadd.xlane.f32.xlu0 %v2126_v48 }
 0x310   :  { %v2086_v18 = vpop.xlane.xlu0 %2085  ;;  %v2083_v50 = vpop.xlane.xlu1 %2082 }
 0x311   :  { %v2098_v27 = vsub.f32 %v4915_v26, %v2086_v18  ;;  %v2097_v5 = vsub.f32 %v4918_v53, %v2083_v50  ;;  %v38_v50 = vld [vmem:[%s5172_s1 + $0xb8] sm:$0xff] }
 0x313   :  { %v2111_v54 = vmul.f32 1.442695, %v2098_v27  ;;  %v2109_v55 = vmul.f32 1.442695, %v2097_v5 }
 0x315   :  { %4393 = vpow2.f32 %v2111_v54 }
 0x316   :  { %4395 = vpow2.f32 %v2109_v55 }
 0x31f   :  { %v4964_v56 = vpop.eup %4393 }
 0x320   :  { %v4966_v57 = vpop.eup %4395  ;;  %v2132_v58 = vsel %vm644_vm3, %v4964_v56, 0.0 }
 0x321   :  { %2133 = vadd.xlane.f32.xlu0 %v2132_v58  ;;  %v2129_v59 = vsel %vm644_vm3, %v4966_v57, 0.0 }
 0x322   :  { %2130 = vadd.xlane.f32.xlu1 %v2129_v59 }
 0x32c   :  { %v2092_v60 = vpop.xlane.xlu0 %2091  ;;  %v2089_v26 = vpop.xlane.xlu1 %2088 }
 0x32d   :  { %v2100_v61 = vsub.f32 %v2066_v22, %v2092_v60  ;;  %v2099_v53 = vsub.f32 %v1991_v49, %v2089_v26 }
 0x32f   :  { %v2115_v62 = vmul.f32 1.442695, %v2100_v61  ;;  %v2113_v1 = vmul.f32 1.442695, %v2099_v53 }
 0x330   :  { %v2234_v63 = vpop.permute.xlu0 %2233  ;;  %v2158_v0 = vpop.permute.xlu1 %2157 }
 0x331   :  { %4397 = vpow2.f32 %v2115_v62  ;;  %4149 = vmatpush3.msra.mxu0 %v2158_v0  ;;  %4154 = vmatpush3.msra.mxu1 %v2234_v63 }
 0x332   :  { %4399 = vpow2.f32 %v2113_v1  ;;  %4158 = vmatprep.subr.mxu0 %v4453_v6  ;;  %4163 = vmatprep.subr.mxu1 %v4453_v6 }
 0x334   :  { %v2310_v8 = vpop.permute.xlu1 %2309  ;;  %v2462_v10 = vpop.permute.xlu0 %2461 }
 0x338   :  { %v2386_v9 = vpop.permute.xlu1 %2385 }
 0x33b   :  { %v4974_v2 = vpop.eup %4397 }
 0x33c   :  { %v4976_v19 = vpop.eup %4399  ;;  %v2138_v4 = vsel %vm644_vm3, %v4974_v2, 0.0  ;;  %v2538_v11 = vpop.permute.xlu1 %2537 }
 0x33d   :  { %2139 = vadd.xlane.f32.xlu0 %v2138_v4  ;;  %v2135_v7 = vsel %vm644_vm3, %v4976_v19, 0.0 }
 0x33e   :  { %2136 = vadd.xlane.f32.xlu1 %v2135_v7 }
 0x34f   :  { %2689 = vrot.lane.b32.xlu1 %v4691_v52, %s4455_s7 }
 0x353   :  { %2613 = vrot.lane.b32.xlu0 %v4689_v51, %s4455_s7 }
 0x374   :  { %v2122_v12 = vpop.xlane.xlu0 %2121 }
 0x375   :  { %4401 = vrcp.f32 %v2122_v12  ;;  %v3355_v12 = vlaneseq }
 0x376   :  { %v2119_v13 = vpop.xlane.xlu1 %2118 }
 0x377   :  { %4403 = vrcp.f32 %v2119_v13  ;;  %v5068_v13 = vshrl.u32 %v3355_v12, 7  ;;  %v50_v12 = vld [vmem:[%s5173_s2 + $0x58] sm:$0xff] }
 0x37f   :  { %v4402_v15 = vpop.eup %4401 }
 0x380   :  { %v2150_v42 = vmul.f32 %v4402_v15, %v4944_v34  ;;  %v3357_v15 = vsub.s32 0, %v5068_v13 }
 0x381   :  { %v4404_v16 = vpop.eup %4403 }
 0x382   :  { %v2149_v20 = vmul.f32 %v4404_v16, %v4948_v37  ;;  %4156 = vmatmul.mubr.msk.f32.vlgmr.msra.gmra.mrb[24].mxu1 %vm644_vm3, %v2150_v42  ;;  %v5074_v42 = vld [vmem:[%s5173_s2 + $0x70] sm:$0xff] }
 0x383   :  { %4164 = vmatpush3.msra.mxu1 %v2386_v9  ;;  %4165 = vmatprep.mubr.msk.f32.mxu1 %vm4452_vm0, %v4453_v6  ;;  %v3358_v16 = vrot.slane %v5074_v42, %v3357_v15 }
 0x384   :  { %4151 = vmatmul.mubr.msk.f32.vlgmr.msra.gmra.mrb[24].mxu0 %vm644_vm3, %v2149_v20  ;;  %4173 = vmatprep.subr.mxu1 %v4453_v6 }
 0x385   :  { %4159 = vmatpush3.msra.mxu0 %v2310_v8  ;;  %4160 = vmatprep.mubr.msk.f32.mxu0 %vm4452_vm0, %v4453_v6 }
 0x386   :  { %4168 = vmatprep.subr.mxu0 %v4453_v6 }
 0x392   :  { %v2125_v51 = vpop.xlane.xlu1 %2124 }
 0x393   :  { %4405 = vrcp.f32 %v2125_v51 }
 0x396   :  { %v2128_v52 = vpop.xlane.xlu0 %2127 }
 0x397   :  { %4407 = vrcp.f32 %v2128_v52 }
 0x39d   :  { %v4406_v21 = vpop.eup %4405 }
 0x39e   :  { %v2151_v29 = vmul.f32 %v4406_v21, %v4954_v43  ;;  %v37_v43 = vld [vmem:[%s5172_s1 + $0x88] sm:$0xff] }
 0x3a0   :  { %4161 = vmatmul.mubr.msk.f32.vlgmr.msra.gmra.mrb[26].mxu0 %vm644_vm3, %v2151_v29 }
 0x3a1   :  { %v4408_v30 = vpop.eup %4407  ;;  %4169 = vmatpush3.msra.mxu0 %v2462_v10  ;;  %4170 = vmatprep.mubr.msk.f32.mxu0 %vm4452_vm0, %v4453_v6 }
 0x3a2   :  { %v2152_v24 = vmul.f32 %v4408_v30, %v4958_v47  ;;  %4178 = vmatprep.subr.mxu0 %v4453_v6 }
 0x3a4   :  { %4166 = vmatmul.mubr.msk.f32.vlgmr.msra.gmra.mrb[26].mxu1 %vm644_vm3, %v2152_v24 }
 0x3a5   :  { %4174 = vmatpush3.msra.mxu1 %v2538_v11  ;;  %4175 = vmatprep.mubr.msk.f32.mxu1 %vm4452_vm0, %v4453_v6 }
 0x3a6   :  { %4183 = vmatprep.subr.mxu1 %v4453_v6 }
 0x3ae   :  { %v2134_v22 = vpop.xlane.xlu0 %2133 }
 0x3af   :  { %4409 = vrcp.f32 %v2134_v22  ;;  %v2131_v49 = vpop.xlane.xlu1 %2130 }
 0x3b0   :  { %4411 = vrcp.f32 %v2131_v49  ;;  %v4425_v49 = vld [vmem:[%s5171_s0 + $0x8] sm:$0xff] }
 0x3b9   :  { %v4410_v31 = vpop.eup %4409 }
 0x3ba   :  { %v4412_v32 = vpop.eup %4411  ;;  %v2154_v23 = vmul.f32 %v4410_v31, %v4964_v56 }
 0x3bb   :  { %v2153_v25 = vmul.f32 %v4412_v32, %v4966_v57  ;;  %v4426_v32 = vld [vmem:[%s5171_s0] sm:$0xff] }
 0x3bc   :  { %4176 = vmatmul.mubr.msk.f32.vlgmr.msra.gmra.mrb[28].mxu1 %vm644_vm3, %v2154_v23 }
 0x3bd   :  { %4171 = vmatmul.mubr.msk.f32.vlgmr.msra.gmra.mrb[28].mxu0 %vm644_vm3, %v2153_v25  ;;  %4185 = vmatprep.mubr.msk.f32.mxu1 %vm4452_vm0, %v4453_v6 }
 0x3be   :  { %4180 = vmatprep.mubr.msk.f32.mxu0 %vm4452_vm0, %v4453_v6 }
 0x3ca   :  { %v2140_v35 = vpop.xlane.xlu0 %2139 }
 0x3cb   :  { %4413 = vrcp.f32 %v2140_v35  ;;  %v2137_v33 = vpop.xlane.xlu1 %2136 }
 0x3cc   :  { %4415 = vrcp.f32 %v2137_v33 }
 0x3ce   :  { %v2614_v36 = vpop.permute.xlu0 %2613 }
 0x3cf   :  { %v2690_v39 = vpop.permute.xlu1 %2689  ;;  %4179 = vmatpush3.msra.mxu0 %v2614_v36 }
 0x3d0   :  { %4184 = vmatpush3.msra.mxu1 %v2690_v39  ;;  %4188 = vmatprep.subr.mxu0 %v4453_v6 }
 0x3d1   :  { %4193 = vmatprep.subr.mxu1 %v4453_v6 }
 0x3d5   :  { %v4414_v34 = vpop.eup %4413 }
 0x3d6   :  { %v4416_v41 = vpop.eup %4415  ;;  %v2156_v37 = vmul.f32 %v4414_v34, %v4974_v2 }
 0x3d7   :  { %v2155_v45 = vmul.f32 %v4416_v41, %v4976_v19 }
 0x3d8   :  { %4186 = vmatmul.mubr.msk.f32.vlgmr.msra.gmra.mrb[30].mxu1 %vm644_vm3, %v2156_v37 }
 0x3d9   :  { %4181 = vmatmul.mubr.msk.f32.vlgmr.msra.gmra.mrb[30].mxu0 %vm644_vm3, %v2155_v45  ;;  %4194 = vmatpush3.msra.mxu1 %v35_v46 }
 0x3da   :  { %4189 = vmatpush3.msra.mxu0 %v35_v46  ;;  %4190 = vmatprep.mubr.msk.f32.mxu0 %vm4452_vm0, %v4453_v6 }
 0x3db   :  { %4195 = vmatprep.mubr.msk.f32.mxu1 %vm4452_vm0, %v4453_v6  ;;  %4198 = vmatprep.subr.mxu0 %v4453_v6 }
 0x3dc   :  { %4203 = vmatprep.subr.mxu1 %v4453_v6 }
 0x455   :  { %v2305_v14 = vpop.f32.mrb[24].mxu1 }
 0x456   :  { %v4157_v38 = vpop.f32.mrb[25].mxu1  ;;  %4196 = vmatmul.mubr.msk.f32.vlgmr.msra.gmra.mrb[32].mxu1 %vm644_vm3, %v2305_v14 }
 0x457   :  { %v2229_v28 = vpop.f32.mrb[24].mxu0  ;;  %4204 = vmatpush3.msra.mxu1 %v36_v17  ;;  %4205 = vmatprep.mubr.msk.f32.mxu1 %vm4452_vm0, %v4453_v6 }
 0x458   :  { %v4152_v40 = vpop.f32.mrb[25].mxu0  ;;  %4191 = vmatmul.mubr.msk.f32.vlgmr.msra.gmra.mrb[32].mxu0 %vm644_vm3, %v2229_v28  ;;  %4213 = vmatprep.subr.mxu1 %v4453_v6  ;;  %v40_v28 = vld [vmem:[%s5173_s2 + $0x8] sm:$0xff] }
 0x459   :  { %4199 = vmatpush3.msra.mxu0 %v36_v17  ;;  %4200 = vmatprep.mubr.msk.f32.mxu0 %vm4452_vm0, %v4453_v6  ;;  %v39_v17 = vld [vmem:[%s5173_s2] sm:$0xff] }
 0x45a   :  { %4208 = vmatprep.subr.mxu0 %v4453_v6  ;;  %v4337_v40 = vpack.c.bf16 %v40_v28, %v39_v17 }
 0x473   :  { %v2381_v44 = vpop.f32.mrb[26].mxu0 }
 0x474   :  { %v4162_v47 = vpop.f32.mrb[27].mxu0  ;;  %4201 = vmatmul.mubr.msk.f32.vlgmr.msra.gmra.mrb[34].mxu0 %vm644_vm3, %v2381_v44  ;;  %v42_v44 = vld [vmem:[%s5173_s2 + $0x18] sm:$0xff] }
 0x475   :  { %4209 = vmatpush3.msra.mxu0 %v37_v43  ;;  %4210 = vmatprep.mubr.msk.f32.mxu0 %vm4452_vm0, %v4453_v6 }
 0x476   :  { %4218 = vmatprep.subr.mxu0 %v4453_v6 }
 0x477   :  { %v2457_v48 = vpop.f32.mrb[26].mxu1 }
 0x478   :  { %v4167_v18 = vpop.f32.mrb[27].mxu1  ;;  %4206 = vmatmul.mubr.msk.f32.vlgmr.msra.gmra.mrb[34].mxu1 %vm644_vm3, %v2457_v48 }
 0x479   :  { %4214 = vmatpush3.msra.mxu1 %v37_v43  ;;  %4215 = vmatprep.mubr.msk.f32.mxu1 %vm4452_vm0, %v4453_v6  ;;  %v41_v43 = vld [vmem:[%s5173_s2 + $0x10] sm:$0xff] }
 0x47a   :  { %4223 = vmatprep.subr.mxu1 %v4453_v6  ;;  %v4340_v47 = vpack.c.bf16 %v42_v44, %v41_v43 }
 0x48f   :  { %v2609_v27 = vpop.f32.mrb[28].mxu1 }
 0x490   :  { %v2533_v5 = vpop.f32.mrb[28].mxu0  ;;  %v4177_v54 = vpop.f32.mrb[29].mxu1  ;;  %4216 = vmatmul.mubr.msk.f32.vlgmr.msra.gmra.mrb[36].mxu1 %vm644_vm3, %v2609_v27 }
 0x491   :  { %v4172_v55 = vpop.f32.mrb[29].mxu0  ;;  %4211 = vmatmul.mubr.msk.f32.vlgmr.msra.gmra.mrb[36].mxu0 %vm644_vm3, %v2533_v5  ;;  %4224 = vmatpush3.msra.mxu1 %v38_v50 }
 0x492   :  { %4219 = vmatpush3.msra.mxu0 %v38_v50  ;;  %4220 = vmatprep.mubr.msk.f32.mxu0 %vm4452_vm0, %v4453_v6  ;;  %v3399_v55 = vsub.s32 1, %v5068_v13 }
 0x493   :  { %4225 = vmatprep.mubr.msk.f32.mxu1 %vm4452_vm0, %v4453_v6  ;;  %4336 = vmatprep.subr.bf16.mxu0 %v4451_v3 }
 0x494   :  { %4342 = vmatprep.subr.bf16.mxu1 %v4451_v3 }
 0x4ab   :  { %v2761_v56 = vpop.f32.mrb[30].mxu1 }
 0x4ac   :  { %v2685_v57 = vpop.f32.mrb[30].mxu0  ;;  %v4187_v58 = vpop.f32.mrb[31].mxu1  ;;  %4226 = vmatmul.mubr.msk.f32.vlgmr.msra.gmra.mrb[38].mxu1 %vm644_vm3, %v2761_v56 }
 0x4ad   :  { %v4182_v59 = vpop.f32.mrb[31].mxu0  ;;  %4221 = vmatmul.mubr.msk.f32.vlgmr.msra.gmra.mrb[38].mxu0 %vm644_vm3, %v2685_v57  ;;  %4247 = vmatprep.mubr.msk.f32.mxu1 %vm4452_vm0, %v4453_v6  ;;  %v5106_v58 = vrot.slane %v5074_v42, %v3399_v55 }
 0x4ae   :  { %4236 = vmatprep.mubr.msk.f32.mxu0 %vm4452_vm0, %v4453_v6  ;;  %4338 = vmatpush3.bf16.msra.mxu0 %v4337_v40 }
 0x4af   :  { %4344 = vmatpush3.bf16.msra.mxu1 %v4337_v40  ;;  %4339 = vmatprep.subr.bf16.mxu0 %v4451_v3 }
 0x4b0   :  { %4345 = vmatprep.subr.bf16.mxu1 %v4451_v3 }
 0x4b2   :  { %4341 = vmatpush3.bf16.msra.mxu0 %v4340_v47 }
 0x4b3   :  { %4347 = vmatpush3.bf16.msra.mxu1 %v4340_v47  ;;  %4348 = vmatprep.subr.bf16.mxu0 %v4451_v3 }
 0x4b4   :  { %4360 = vmatprep.subr.bf16.mxu1 %v4451_v3 }
 0x529   :  { %v2907_v60 = vpop.f32.mrb[32].mxu1 }
 0x52a   :  { %v4197_v26 = vpop.f32.mrb[33].mxu1 }
 0x52b   :  { %v2834_v61 = vpop.f32.mrb[32].mxu0  ;;  %v44_v26 = vld [vmem:[%s5173_s2 + $0x28] sm:$0xff] }
 0x52c   :  { %v4192_v53 = vpop.f32.mrb[33].mxu0 }
 0x547   :  { %v2980_v62 = vpop.f32.mrb[34].mxu0 }
 0x548   :  { %v3349_v1 = vadd.f32 %v2980_v62, %v2834_v61  ;;  %v4202_v63 = vpop.f32.mrb[35].mxu0 }
 0x54b   :  { %v3053_v0 = vpop.f32.mrb[34].mxu1 }
 0x54c   :  { %v3350_v2 = vadd.f32 %v3053_v0, %v2907_v60  ;;  %v4207_v19 = vpop.f32.mrb[35].mxu1  ;;  %v43_v60 = vld [vmem:[%s5173_s2 + $0x20] sm:$0xff]  ;;  %v45_v0 = vld [vmem:[%s5173_s2 + $0x30] sm:$0xff] }
 0x54d   :  { %v4349_v62 = vpack.c.bf16 %v44_v26, %v43_v60 }
 0x563   :  { %v3199_v4 = vpop.f32.mrb[36].mxu1 }
 0x564   :  { %v3126_v7 = vpop.f32.mrb[36].mxu0  ;;  %v3352_v8 = vadd.f32 %v3350_v2, %v3199_v4  ;;  %v4217_v9 = vpop.f32.mrb[37].mxu1  ;;  %v46_v2 = vld [vmem:[%s5173_s2 + $0x38] sm:$0xff] }
 0x565   :  { %v3351_v10 = vadd.f32 %v3349_v1, %v3126_v7  ;;  %v4212_v11 = vpop.f32.mrb[37].mxu0  ;;  %v4352_v4 = vpack.c.bf16 %v46_v2, %v45_v0  ;;  %v48_v9 = vld [vmem:[%s5173_s2 + $0x48] sm:$0xff] }
 0x566   :  { %v49_v11 = vld [vmem:[%s5173_s2 + $0x50] sm:$0xff] }
 0x567   :  { %v4358_v15 = vpack.c.bf16 %v50_v12, %v49_v11 }
 0x57f   :  { %v3345_v20 = vpop.f32.mrb[38].mxu1 }
 0x580   :  { %v3272_v51 = vpop.f32.mrb[38].mxu0  ;;  %v3354_v52 = vadd.f32 %v3352_v8, %v3345_v20  ;;  %v4227_v21 = vpop.f32.mrb[39].mxu1  ;;  %v47_v8 = vld [vmem:[%s5173_s2 + $0x40] sm:$0xff]  ;;  %v3405_v20 = vsub.s32 3, %v5068_v13  ;;  %s4461_s2 = smov [#allocation2]  }
 0x581   :  { %v3353_v29 = vadd.f32 %v3351_v10, %v3272_v51  ;;  %v4222_v30 = vpop.f32.mrb[39].mxu0  ;;  %v4355_v10 = vpack.c.bf16 %v48_v9, %v47_v8  ;;  %s3753_s22 = sshll.u32 %s4461_s2, 4  ;;  %s3754_s22 = int_to_ptr.vmem [resolvable:$true] %s3753_s22 }
 0x582   :  { %v3360_v24 = vadd.f32 %v3358_v16, %v3354_v52  ;;  %p4432_p1 = scmp.lt.s32.totalorder %s3754_s22, %s3754_s22 }
 0x583   :  { %v3359_v22 = vadd.f32 %v3358_v16, %v3353_v29 }
 0x584   :  { %v3362_v31 = vadd.f32 %v4425_v49, %v3360_v24 }
 0x585   :  { %v3361_v23 = vadd.f32 %v4426_v32, %v3359_v22 }
 0x586   :  { %v3367_v25 = vsel %vm3363_vm4, %v3362_v31, 0.0 }
 0x587   :  { %3368 = vadd.xlane.f32.xlu1 %v3367_v25  ;;  %v3364_v35 = vsel %vm3363_vm4, %v3361_v23, 0.0 }
 0x588   :  { %3365 = vadd.xlane.f32.xlu0 %v3364_v35 }
 0x598   :  { %3392 = vrot.lane.b32.xlu1 %v3358_v16, %s4457_s9 }
 0x614   :  { %v3369_v33 = vpop.xlane.xlu1 %3368 }
 0x615   :  { %v3372_v36 = vmul.f32 0.03125, %v3369_v33  ;;  %v3366_v39 = vpop.xlane.xlu0 %3365 }
 0x616   :  { %v3371_v34 = vmul.f32 0.03125, %v3366_v39 }
 0x617   :  { %v3374_v41 = vsub.f32 %v3362_v31, %v3372_v36 }
 0x618   :  { %v3373_v37 = vsub.f32 %v3361_v23, %v3371_v34  ;;  %v3393_v57 = vpop.permute.xlu1 %3392 }
 0x619   :  { %v3376_v14 = vmul.f32 %v3374_v41, %v3374_v41 }
 0x61a   :  { %v3375_v45 = vmul.f32 %v3373_v37, %v3373_v37 }
 0x61b   :  { %v3380_v38 = vsel %vm3363_vm4, %v3376_v14, 0.0 }
 0x61c   :  { %v3377_v46 = vsel %vm3363_vm4, %v3375_v45, 0.0 }
 0x61d   :  { %3378 = vadd.xlane.f32.xlu0 %v3377_v46 }
 0x621   :  { %3381 = vadd.xlane.f32.xlu0 %v3380_v38 }
 0x6aa   :  { %v3379_v48 = vpop.xlane.xlu0 %3378 }
 0x6ab   :  { %v3383_v18 = vmul.f32 0.03125, %v3379_v48 }
 0x6ad   :  { %v3385_v50 = vadd.f32 1e-06, %v3383_v18 }
 0x6ae   :  { %v3382_v27 = vpop.xlane.xlu0 %3381 }
 0x6af   :  { %4417 = vrsqrt.f32 %v3385_v50  ;;  %v3384_v5 = vmul.f32 0.03125, %v3382_v27 }
 0x6b1   :  { %v3386_v54 = vadd.f32 1e-06, %v3384_v5 }
 0x6b3   :  { %4419 = vrsqrt.f32 %v3386_v54 }
 0x6b9   :  { %v4418_v56 = vpop.eup %4417 }
 0x6ba   :  { %v3389_v59 = vmul.f32 %v4418_v56, %v3373_v37 }
 0x6bc   :  { %v3395_v61 = vmul.f32 %v3393_v57, %v3389_v59 }
 0x6bd   :  { %v4420_v53 = vpop.eup %4419 }
 0x6be   :  { %v3390_v1 = vmul.f32 %v4420_v53, %v3374_v41  ;;  %v3401_v63 = vadd.f32 %v5106_v58, %v3395_v61 }
 0x6c0   :  { %v3396_v19 = vmul.f32 %v3393_v57, %v3390_v1  ;;  %4237 = vmatmul.mubr.msk.f32.vlgmr.msra.gmra.mrb[40].mxu0 %vm3363_vm4, %v3401_v63 }
 0x6c1   :  { %4350 = vmatpush3.bf16.msra.mxu0 %v4349_v62  ;;  %4266 = vmatprep.mubr.msk.f32.mxu0 %vm4452_vm0, %v4453_v6 }
 0x6c2   :  { %v3402_v7 = vadd.f32 %v5106_v58, %v3396_v19  ;;  %4351 = vmatprep.subr.bf16.mxu0 %v4451_v3 }
 0x6c4   :  { %4248 = vmatmul.mubr.msk.f32.vlgmr.msra.gmra.mrb[40].mxu1 %vm3363_vm4, %v3402_v7 }
 0x6c5   :  { %4353 = vmatpush3.bf16.msra.mxu0 %v4352_v4  ;;  %4362 = vmatpush3.bf16.msra.mxu1 %v4349_v62 }
 0x6c6   :  { %4354 = vmatprep.subr.bf16.mxu0 %v4451_v3  ;;  %4363 = vmatprep.subr.bf16.mxu1 %v4451_v3 }
 0x6c7   :  { %4285 = vmatprep.mubr.msk.f32.mxu1 %vm4452_vm0, %v4453_v6  ;;  %v3557_v6 = vsub.s32 2, %v5068_v13 }
 0x6c9   :  { %4356 = vmatpush3.bf16.msra.mxu0 %v4355_v10  ;;  %4365 = vmatpush3.bf16.msra.mxu1 %v4352_v4  ;;  %v3558_v16 = vrot.slane %v5074_v42, %v3557_v6 }
 0x6ca   :  { %4357 = vmatprep.subr.bf16.mxu0 %v4451_v3  ;;  %4366 = vmatprep.subr.bf16.mxu1 %v4451_v3 }
 0x6cb   :  { %3560 = vrot.lane.b32.xlu0 %v3558_v16, %s4457_s9 }
 0x6cd   :  { %4368 = vmatpush3.bf16.msra.mxu1 %v4355_v10  ;;  %4359 = vmatpush3.bf16.msra.mxu0 %v4358_v15 }
 0x6ce   :  { %4369 = vmatprep.subr.bf16.mxu1 %v4451_v3  ;;  %v3406_v3 = vrot.slane %v5074_v42, %v3405_v20 }
 0x6d1   :  { %4371 = vmatpush3.bf16.msra.mxu1 %v4358_v15 }
 0x73d   :  { %v3561_v31 = vpop.permute.xlu0 %3560 }
 0x793   :  { %v3476_v51 = vpop.f32.mrb[40].mxu0 }
 0x794   :  { %v3477_v52 = vadd.f32 %v3476_v51, %v3406_v3  ;;  %v4238_v21 = vpop.f32.mrb[41].mxu0 }
 0x796   :  { %v3553_v29 = vmax.f32 %v3477_v52, 0.0 }
 0x797   :  { %v3549_v30 = vpop.f32.mrb[40].mxu1 }
 0x798   :  { %v3550_v24 = vadd.f32 %v3549_v30, %v3406_v3  ;;  %v4249_v22 = vpop.f32.mrb[41].mxu1  ;;  %4267 = vmatmul.mubr.msk.f32.vlgmr.msra.gmra.mrb[42].mxu0 %vm3563_vm5, %v3553_v29 }
 0x79a   :  { %v3554_v49 = vmax.f32 %v3550_v24, 0.0 }
 0x79c   :  { %4286 = vmatmul.mubr.msk.f32.vlgmr.msra.gmra.mrb[42].mxu1 %vm3563_vm5, %v3554_v49 }
 0x86b   :  { %v3633_v32 = vpop.f32.mrb[42].mxu0 }
 0x86c   :  { %v3634_v23 = vadd.f32 %v3633_v32, %v3561_v31  ;;  %v4268_v25 = vpop.f32.mrb[43].mxu0 }
 0x86e   :  { %v3710_v35 = vadd.f32 %v3634_v23, %v3401_v63 }
 0x86f   :  { %v3706_v33 = vpop.f32.mrb[42].mxu1 }
 0x870   :  { %v3707_v13 = vadd.f32 %v3706_v33, %v3561_v31  ;;  %v4287_v36 = vpop.f32.mrb[43].mxu1  ;;  %v3712_v42 = vsel %vm3363_vm4, %v3710_v35, 0.0 }
 0x871   :  { %3713 = vadd.xlane.f32.xlu1 %v3712_v42 }
 0x872   :  { %v3711_v39 = vadd.f32 %v3707_v13, %v3402_v7 }
 0x874   :  { %v3715_v34 = vsel %vm3363_vm4, %v3711_v39, 0.0 }
 0x875   :  { %3716 = vadd.xlane.f32.xlu0 %v3715_v34 }
 0x8fe   :  { %v3714_v41 = vpop.xlane.xlu1 %3713 }
 0x8ff   :  { %v3718_v37 = vmul.f32 0.03125, %v3714_v41 }
 0x901   :  { %v3720_v45 = vsub.f32 %v3710_v35, %v3718_v37 }
 0x902   :  { %v3717_v46 = vpop.xlane.xlu0 %3716 }
 0x903   :  { %v3719_v14 = vmul.f32 0.03125, %v3717_v46  ;;  %v3722_v38 = vmul.f32 %v3720_v45, %v3720_v45 }
 0x905   :  { %v3721_v17 = vsub.f32 %v3711_v39, %v3719_v14  ;;  %v3724_v28 = vsel %vm3363_vm4, %v3722_v38, 0.0 }
 0x906   :  { %3725 = vadd.xlane.f32.xlu1 %v3724_v28 }
 0x907   :  { %v3723_v40 = vmul.f32 %v3721_v17, %v3721_v17 }
 0x909   :  { %v3727_v43 = vsel %vm3363_vm4, %v3723_v40, 0.0 }
 0x90a   :  { %3728 = vadd.xlane.f32.xlu0 %v3727_v43 }
 0x917   :  { %3739 = vrot.lane.b32.xlu1 %v5106_v58, %s4457_s9  ;;  %s4427_s9 = scalar_lea.vmem %s3754_s22, 256 }
 0x918   :  { %p4428_p0 = scmp.ne.s32.totalorder %s3754_s22, %s4427_s9  ;;  %p4433_p2 = scmp.lt.s32.totalorder %s4427_s9, %s4427_s9 }
 0x91a   :  { %p4434_p3 = por %p4433_p2, %p4432_p1 }
 0x91c   :  { %p4435_p4 = pnand %p4434_p3, %p4428_p0 }
 0x993   :  { %v3726_v44 = vpop.xlane.xlu1 %3725 }
 0x994   :  { %v3730_v47 = vmul.f32 0.03125, %v3726_v44 }
 0x996   :  { %v3732_v48 = vadd.f32 1e-06, %v3730_v47 }
 0x997   :  { %v3729_v18 = vpop.xlane.xlu0 %3728  ;;  %v3740_v54 = vpop.permute.xlu1 %3739 }
 0x998   :  { %4421 = vrsqrt.f32 %v3732_v48  ;;  %v3731_v50 = vmul.f32 0.03125, %v3729_v18 }
 0x99a   :  { %v3733_v27 = vadd.f32 1e-06, %v3731_v50 }
 0x99c   :  { %4423 = vrsqrt.f32 %v3733_v27 }
 0x9a2   :  { %v4422_v5 = vpop.eup %4421 }
 0x9a3   :  { %v3736_v55 = vmul.f32 %v4422_v5, %v3720_v45 }
 0x9a5   :  { %v3742_v56 = vmul.f32 %v3740_v54, %v3736_v55 }
 0x9a6   :  { %v4424_v57 = vpop.eup %4423 }
 0x9a7   :  { %v3737_v59 = vmul.f32 %v4424_v57, %v3721_v17  ;;  %v3744_v60 = vadd.f32 %v3742_v56, %v3558_v16 }
 0x9a9   :  { %v3743_v26 = vmul.f32 %v3740_v54, %v3737_v59  ;;  %3746 = vst.msk [vmem:[#allocation2] sm:$0xff] %vm3363_vm4, %v3744_v60 }
 0x9ab   :  { %v3745_v58 = vadd.f32 %v3743_v26, %v3558_v16 }
 0x9ad   :  { %3747 = vst.msk [vmem:[#allocation2 + $0x8] sm:$0xff] %vm3363_vm4, %v3745_v58 }
 0x9ae   :  { %4438 = shalt.err (!%p4435_p4)
}
 0x9af   :  { %s4439_s25 = scalar_lea.hbm %s5174_s3, 256 }
 0x9b0   :  { %p4440_p5 = scmp.ne.s32.totalorder %s5174_s3, %s4439_s25  ;;  %p4443_p6 = scmp.lt.u32.totalorder %s4439_s25, %s5174_s3 }
 0x9b2   :  { %p4445_p7 = pnand %p4443_p6, %p4440_p5 }
 0x9b4   :  { %4448 = shalt.err (!%p4445_p7)
}
 0x9b5   :  { %s4462_s29 = smov 128   ;;  %s4463_s30 = smov 8  }
 0x9b6   :  { %3759 = dma.vmem_to_hbm [thread:$0]  %s3754_s22, 256, %s5174_s3, [#allocation3], %s4462_s29, %s4462_s29, %s4463_s30  }
 0x9b7   :  { %4449 = dma.done.wait [#allocation3], 256  }
 0x9b8   :  { %4450 = vsyncadd [#allocation3], 4294967040 }
 0x9b9   :  { %3763 = vsyncpa [#allocation3], 1 }

</bundles_post_ra>
